<compile_context>
chip_gen: v7x
topology: tpu7x:2x2x1
jax: 0.10.0
libtpu: 0.0.40
codegen_flags: <defaults>
</compile_context>

<pallas_src>
import jax
import jax.numpy as jnp
from jax import lax
from jax.experimental import pallas as pl
from jax.experimental.pallas import tpu as pltpu
import numpy as np


def _round_up(x, m):
    return (x + m - 1) // m * m


def generator_kernel(z_ref, w1_ref, b1_ref, wc1_ref, bc1_ref,
                     wc2_ref, bc2_ref, wfc_ref, bfc_ref, o_ref, pad_ref):
    Bblk = z_ref.shape[0]
    Hp = wc1_ref.shape[1]
    L = w1_ref.shape[1] // Hp
    BL = Bblk * L

    # ---- fc1: (Bblk, N) @ (N, L*Hp) + b1 (bf16 operands, f32 accumulate) ----
    h0 = jnp.dot(z_ref[...], w1_ref[...], preferred_element_type=jnp.float32)
    h0 = h0 + b1_ref[...]                                      # (Bblk, L*Hp) f32

    # ---- zero-padded conv scratch (channel-last, bf16) ----------------------
    zrow = jnp.zeros((Bblk, Hp), jnp.bfloat16)
    pad_ref[:, 0, :] = zrow                                    # Conv1d left pad
    pad_ref[:, L + 1, :] = zrow                                # Conv1d right pad
    pad_ref[:, 1:L + 1, :] = h0.reshape(Bblk, L, Hp).astype(jnp.bfloat16)

    def conv_relu(wc_ref, bc_ref):
        # Three accumulated K=Hp dots instead of a concatenated im2col matmul.
        t0 = pad_ref[:, 0:L, :].reshape(BL, Hp)
        t1 = pad_ref[:, 1:L + 1, :].reshape(BL, Hp)
        t2 = pad_ref[:, 2:L + 2, :].reshape(BL, Hp)
        y = (jnp.dot(t0, wc_ref[0], preferred_element_type=jnp.float32)
             + jnp.dot(t1, wc_ref[1], preferred_element_type=jnp.float32)
             + jnp.dot(t2, wc_ref[2], preferred_element_type=jnp.float32))
        return jnp.maximum(y + bc_ref[...], 0.0)               # (BL, Hp) f32

    h1 = conv_relu(wc1_ref, bc1_ref)
    pad_ref[:, 1:L + 1, :] = h1.reshape(Bblk, L, Hp).astype(jnp.bfloat16)
    h2 = conv_relu(wc2_ref, bc2_ref)

    # ---- fc2: (Bblk*L, Hp) @ (Hp, Fp) + bias --------------------------------
    out = jnp.dot(h2.astype(jnp.bfloat16), wfc_ref[...],
                  preferred_element_type=jnp.float32)
    o_ref[...] = (out + bfc_ref[...]).astype(o_ref.dtype)      # (BL, Fp)


def _pick_batch_block(B, L, N, Hp, Fp):
    """Largest useful batch block: fc1 M ~256, sublane-aligned, VMEM-budgeted,
    and keeping >=2 grid steps when possible (two TensorCores on v7x)."""
    budget = 20 * 1024 * 1024       # well under default scoped VMEM everywhere
    fixed = 2 * (N * L * Hp * 2 + L * Hp * 4 + 6 * Hp * Hp * 2 + 2 * Hp * 4
                 + Hp * Fp * 2 + Fp * 4)          # double-buffered weights/biases

    def footprint(d):
        return (fixed
                + 2 * d * N * 2                    # z block (bf16, 2 buffers)
                + 2 * d * L * Fp * 4               # output block (f32, 2 buffers)
                + d * (L + 2) * Hp * 2             # padded conv scratch (bf16)
                + 4 * d * L * Hp * 4)              # ~4 live f32 activation planes

    cands = [d for d in range(1, B + 1)
             if B % d == 0 and (d == B or d % 8 == 0) and footprint(d) <= budget]
    if not cands:
        return 1
    target = 256                                   # fc1 MXU rows (>=128 for v5e)
    multi = [d for d in cands if B // d >= 2]
    pool = multi if multi else cands
    big = [d for d in pool if d >= target]
    return min(big) if big else max(pool)


def generator_forward(z, w1, b1, wc1, bc1, wc2, bc2, wfc2, bfc2,
                      max_length, hidden_dim):
    """z: (B, noise_dim) f32.  Returns (B, max_length, feature_dim), matching
    the PyTorch Generator.forward semantics."""
    B, N = z.shape
    L, H = max_length, hidden_dim
    F = wfc2.shape[0]
    Hp = _round_up(H, 128)
    Fp = _round_up(F, 128)

    # ---- host-side repack: pad H->Hp / F->Fp with zeros, cast weights bf16 --
    w1_3 = jnp.transpose(w1.reshape(L, H, N), (2, 0, 1))              # (N, L, H)
    w1t = jnp.pad(w1_3, ((0, 0), (0, 0), (0, Hp - H))
                  ).reshape(N, L * Hp).astype(jnp.bfloat16)           # (N, L*Hp)
    b1r = jnp.pad(b1.reshape(L, H), ((0, 0), (0, Hp - H))).reshape(1, L * Hp)
    # Conv taps: tap k weight W_k[i, o] = wc[o, i, k]  -> (3, Hp, Hp)
    wc1p = jnp.pad(jnp.transpose(wc1, (2, 1, 0)),
                   ((0, 0), (0, Hp - H), (0, Hp - H))).astype(jnp.bfloat16)
    wc2p = jnp.pad(jnp.transpose(wc2, (2, 1, 0)),
                   ((0, 0), (0, Hp - H), (0, Hp - H))).astype(jnp.bfloat16)
    bc1r = jnp.pad(bc1, (0, Hp - H)).reshape(1, Hp)
    bc2r = jnp.pad(bc2, (0, Hp - H)).reshape(1, Hp)
    wfct = jnp.pad(jnp.transpose(wfc2, (1, 0)),
                   ((0, Hp - H), (0, Fp - F))).astype(jnp.bfloat16)   # (Hp, Fp)
    bfcr = jnp.pad(bfc2, (0, Fp - F)).reshape(1, Fp)
    zb = z.astype(jnp.bfloat16)

    Bblk = _pick_batch_block(B, L, N, Hp, Fp)
    grid = (B // Bblk,)

    def full(shape):
        n = len(shape)
        return pl.BlockSpec(shape, lambda i, _n=n: (0,) * _n)

    flops = 2 * B * (N * L * Hp + 2 * 3 * L * Hp * Hp + L * Hp * Fp)
    bytes_accessed = (2 * (zb.size + w1t.size + wc1p.size + wc2p.size + wfct.size)
                      + 4 * (b1r.size + bc1r.size + bc2r.size + bfcr.size)
                      + 4 * B * L * Fp)

    out = pl.pallas_call(
        generator_kernel,
        out_shape=jax.ShapeDtypeStruct((B * L, Fp), jnp.float32),
        grid=grid,
        in_specs=[
            pl.BlockSpec((Bblk, N), lambda i: (i, 0)),
            full((N, L * Hp)),
            full((1, L * Hp)),
            full((3, Hp, Hp)),
            full((1, Hp)),
            full((3, Hp, Hp)),
            full((1, Hp)),
            full((Hp, Fp)),
            full((1, Fp)),
        ],
        out_specs=pl.BlockSpec((Bblk * L, Fp), lambda i: (i, 0)),
        scratch_shapes=[pltpu.VMEM((Bblk, L + 2, Hp), jnp.bfloat16)],
        compiler_params=pltpu.CompilerParams(
            dimension_semantics=("parallel",),
            vmem_limit_bytes=32 * 1024 * 1024),
        cost_estimate=pl.CostEstimate(
            flops=flops, transcendentals=0, bytes_accessed=bytes_accessed),
    )(zb, w1t, b1r, wc1p, bc1r, wc2p, bc2r, wfct, bfcr)

    return out.reshape(B, L, Fp)[:, :, :F]


def generator_reference(z, w1, b1, wc1, bc1, wc2, bc2, wfc2, bfc2,
                        max_length, hidden_dim):
    """Pure-JAX f32 reference matching the PyTorch module exactly."""
    B = z.shape[0]
    L, H = max_length, hidden_dim
    h = z @ w1.T + b1[None, :]                                # fc1
    h = h.reshape(B, L, H)
    h = jnp.transpose(h, (0, 2, 1))                           # (B, H, L)
    dn = ('NCH', 'OIH', 'NCH')
    h = lax.conv_general_dilated(h, wc1, (1,), [(1, 1)], dimension_numbers=dn)
    h = jnp.maximum(h + bc1[None, :, None], 0.0)
    h = lax.conv_general_dilated(h, wc2, (1,), [(1, 1)], dimension_numbers=dn)
    h = jnp.maximum(h + bc2[None, :, None], 0.0)
    h = jnp.transpose(h, (0, 2, 1))                           # (B, L, H)
    return h @ wfc2.T + bfc2[None, None, :]                   # fc2


if __name__ == "__main__":
    # batch, noise_dim, max_length, feature_dim, hidden_dim (small test shapes)
    B, N, L, F, H = 2, 16, 16, 8, 32

    key = jax.random.PRNGKey(0)
    kz, k1, k2, k3, k4, k5, k6, k7, k8 = jax.random.split(key, 9)

    z = jax.random.normal(kz, (B, N), jnp.float32)

    # Deterministic synthetic parameters (PyTorch layer shapes).
    w1 = jax.random.normal(k1, (L * H, N), jnp.float32) * 0.1       # fc1.weight
    b1 = jax.random.normal(k2, (L * H,), jnp.float32) * 0.05        # fc1.bias
    wc1 = jax.random.normal(k3, (H, H, 3), jnp.float32) * 0.1       # conv1.weight
    bc1 = jax.random.normal(k4, (H,), jnp.float32) * 0.05           # conv1.bias
    wc2 = jax.random.normal(k5, (H, H, 3), jnp.float32) * 0.1       # conv2.weight
    bc2 = jax.random.normal(k6, (H,), jnp.float32) * 0.05           # conv2.bias
    wfc2 = jax.random.normal(k7, (F, H), jnp.float32) * 0.1         # fc2.weight
    bfc2 = jax.random.normal(k8, (F,), jnp.float32) * 0.05          # fc2.bias

    out = generator_forward(z, w1, b1, wc1, bc1, wc2, bc2, wfc2, bfc2, L, H)
    out = jax.block_until_ready(out)

    ref = generator_reference(z, w1, b1, wc1, bc1, wc2, bc2, wfc2, bfc2, L, H)
    ref = jax.block_until_ready(ref)

    assert out.shape == (B, L, F)
    # bf16 MXU operands vs. f32 reference: tolerance loosened per review.
    np.testing.assert_allclose(np.asarray(out), np.asarray(ref),
                               rtol=2e-2, atol=2e-2)
    # TODO(synk): Generator.generate()'s torch.randn sampling + softmax are
    # host-side wrappers around forward() and are intentionally left outside.
    print("KERNEL_OK")
</pallas_src>

<mosaic_0001>
module attributes {stable_mosaic.version = 11 : i64} {
  func.func @generator_kernel(%arg0: i32, %arg1: memref<2x16xbf16, #tpu.memory_space<vmem>>, %arg2: memref<16x2048xbf16, #tpu.memory_space<vmem>>, %arg3: memref<1x2048xf32, #tpu.memory_space<vmem>>, %arg4: memref<3x128x128xbf16, #tpu.memory_space<vmem>>, %arg5: memref<1x128xf32, #tpu.memory_space<vmem>>, %arg6: memref<3x128x128xbf16, #tpu.memory_space<vmem>>, %arg7: memref<1x128xf32, #tpu.memory_space<vmem>>, %arg8: memref<128x128xbf16, #tpu.memory_space<vmem>>, %arg9: memref<1x128xf32, #tpu.memory_space<vmem>>, %arg10: memref<32x128xf32, #tpu.memory_space<vmem>>, %arg11: memref<2x18x128xbf16, #tpu.memory_space<vmem>>) attributes {dimension_semantics = [#tpu.dimension_semantics<parallel>], iteration_bounds = array<i64: 1>, scalar_prefetch = 0 : i64, scratch_operands = 1 : i64, tpu.core_type = #tpu.core_type<tc>, window_params = [{transform_indices = @transform_0, window_bounds = array<i64: 2, 16>}, {pipeline_mode = #tpu.pipeline_mode<synchronous>, transform_indices = @transform_1, window_bounds = array<i64: 16, 2048>}, {pipeline_mode = #tpu.pipeline_mode<synchronous>, transform_indices = @transform_2, window_bounds = array<i64: 1, 2048>}, {pipeline_mode = #tpu.pipeline_mode<synchronous>, transform_indices = @transform_3, window_bounds = array<i64: 3, 128, 128>}, {pipeline_mode = #tpu.pipeline_mode<synchronous>, transform_indices = @transform_4, window_bounds = array<i64: 1, 128>}, {pipeline_mode = #tpu.pipeline_mode<synchronous>, transform_indices = @transform_5, window_bounds = array<i64: 3, 128, 128>}, {pipeline_mode = #tpu.pipeline_mode<synchronous>, transform_indices = @transform_6, window_bounds = array<i64: 1, 128>}, {pipeline_mode = #tpu.pipeline_mode<synchronous>, transform_indices = @transform_7, window_bounds = array<i64: 128, 128>}, {pipeline_mode = #tpu.pipeline_mode<synchronous>, transform_indices = @transform_8, window_bounds = array<i64: 1, 128>}, {transform_indices = @transform_9, window_bounds = array<i64: 32, 128>}]} {
    %c0 = arith.constant 0 : index
    %c0_0 = arith.constant 0 : index
    %0 = vector.load %arg1[%c0, %c0_0] : memref<2x16xbf16, #tpu.memory_space<vmem>>, vector<2x16xbf16>
    %c0_1 = arith.constant 0 : index
    %c0_2 = arith.constant 0 : index
    %1 = vector.load %arg2[%c0_1, %c0_2] : memref<16x2048xbf16, #tpu.memory_space<vmem>>, vector<16x2048xbf16>
    %cst = arith.constant dense<0.000000e+00> : vector<2x2048xf32>
    %2 = tpu.matmul %0, %1, %cst {dimension_numbers = #tpu.dot_dimension_numbers<[1], [0], [0], [1], [0, 0, 1, 1], [], []>} : vector<2x16xbf16>, vector<16x2048xbf16>, vector<2x2048xf32> -> vector<2x2048xf32>
    %c0_3 = arith.constant 0 : index
    %c0_4 = arith.constant 0 : index
    %3 = vector.load %arg3[%c0_3, %c0_4] : memref<1x2048xf32, #tpu.memory_space<vmem>>, vector<1x2048xf32>
    %4 = vector.broadcast %3 : vector<1x2048xf32> to vector<2x2048xf32>
    %5 = arith.addf %2, %4 : vector<2x2048xf32>
    %cst_5 = arith.constant 0.000000e+00 : bf16
    %6 = vector.broadcast %cst_5 : bf16 to vector<2x128xbf16>
    %c0_6 = arith.constant 0 : index
    %c0_7 = arith.constant 0 : index
    %c0_8 = arith.constant 0 : index
    %7 = vector.load %arg11[%c0_6, %c0_7, %c0_8] : memref<2x18x128xbf16, #tpu.memory_space<vmem>>, vector<2x1x128xbf16>
    %8 = vector.shape_cast %7 : vector<2x1x128xbf16> to vector<2x128xbf16>
    %9 = vector.shape_cast %6 : vector<2x128xbf16> to vector<2x1x128xbf16>
    tpu.vector_store %arg11[%c0_6, %c0_7, %c0_8], %9 {strides = array<i32>} : memref<2x18x128xbf16, #tpu.memory_space<vmem>>, vector<2x1x128xbf16>,
    %c0_9 = arith.constant 0 : index
    %c17 = arith.constant 17 : index
    %c0_10 = arith.constant 0 : index
    %10 = vector.load %arg11[%c0_9, %c17, %c0_10] : memref<2x18x128xbf16, #tpu.memory_space<vmem>>, vector<2x1x128xbf16>
    %11 = vector.shape_cast %10 : vector<2x1x128xbf16> to vector<2x128xbf16>
    %12 = vector.shape_cast %6 : vector<2x128xbf16> to vector<2x1x128xbf16>
    tpu.vector_store %arg11[%c0_9, %c17, %c0_10], %12 {strides = array<i32>} : memref<2x18x128xbf16, #tpu.memory_space<vmem>>, vector<2x1x128xbf16>,
    %13 = vector.shape_cast %5 : vector<2x2048xf32> to vector<2x16x128xf32>
    %14 = arith.truncf %13 : vector<2x16x128xf32> to vector<2x16x128xbf16>
    %c0_11 = arith.constant 0 : index
    %c1 = arith.constant 1 : index
    %c0_12 = arith.constant 0 : index
    %15 = vector.load %arg11[%c0_11, %c1, %c0_12] : memref<2x18x128xbf16, #tpu.memory_space<vmem>>, vector<2x16x128xbf16>
    tpu.vector_store %arg11[%c0_11, %c1, %c0_12], %14 {strides = array<i32>} : memref<2x18x128xbf16, #tpu.memory_space<vmem>>, vector<2x16x128xbf16>,
    %c0_13 = arith.constant 0 : index
    %c0_14 = arith.constant 0 : index
    %c0_15 = arith.constant 0 : index
    %16 = vector.load %arg11[%c0_13, %c0_14, %c0_15] : memref<2x18x128xbf16, #tpu.memory_space<vmem>>, vector<2x16x128xbf16>
    %17 = vector.shape_cast %16 : vector<2x16x128xbf16> to vector<32x128xbf16>
    %c0_16 = arith.constant 0 : index
    %c1_17 = arith.constant 1 : index
    %c0_18 = arith.constant 0 : index
    %18 = vector.load %arg11[%c0_16, %c1_17, %c0_18] : memref<2x18x128xbf16, #tpu.memory_space<vmem>>, vector<2x16x128xbf16>
    %19 = vector.shape_cast %18 : vector<2x16x128xbf16> to vector<32x128xbf16>
    %c0_19 = arith.constant 0 : index
    %c2 = arith.constant 2 : index
    %c0_20 = arith.constant 0 : index
    %20 = vector.load %arg11[%c0_19, %c2, %c0_20] : memref<2x18x128xbf16, #tpu.memory_space<vmem>>, vector<2x16x128xbf16>
    %21 = vector.shape_cast %20 : vector<2x16x128xbf16> to vector<32x128xbf16>
    %c0_21 = arith.constant 0 : index
    %c0_22 = arith.constant 0 : index
    %c0_23 = arith.constant 0 : index
    %22 = vector.load %arg4[%c0_21, %c0_22, %c0_23] : memref<3x128x128xbf16, #tpu.memory_space<vmem>>, vector<1x128x128xbf16>
    %23 = vector.shape_cast %22 : vector<1x128x128xbf16> to vector<128x128xbf16>
    %cst_24 = arith.constant dense<0.000000e+00> : vector<32x128xf32>
    %24 = tpu.matmul %17, %23, %cst_24 {dimension_numbers = #tpu.dot_dimension_numbers<[1], [0], [0], [1], [0, 0, 1, 1], [], []>} : vector<32x128xbf16>, vector<128x128xbf16>, vector<32x128xf32> -> vector<32x128xf32>
    %c1_25 = arith.constant 1 : index
    %c0_26 = arith.constant 0 : index
    %c0_27 = arith.constant 0 : index
    %25 = vector.load %arg4[%c1_25, %c0_26, %c0_27] : memref<3x128x128xbf16, #tpu.memory_space<vmem>>, vector<1x128x128xbf16>
    %26 = vector.shape_cast %25 : vector<1x128x128xbf16> to vector<128x128xbf16>
    %cst_28 = arith.constant dense<0.000000e+00> : vector<32x128xf32>
    %27 = tpu.matmul %19, %26, %cst_28 {dimension_numbers = #tpu.dot_dimension_numbers<[1], [0], [0], [1], [0, 0, 1, 1], [], []>} : vector<32x128xbf16>, vector<128x128xbf16>, vector<32x128xf32> -> vector<32x128xf32>
    %28 = arith.addf %24, %27 : vector<32x128xf32>
    %c2_29 = arith.constant 2 : index
    %c0_30 = arith.constant 0 : index
    %c0_31 = arith.constant 0 : index
    %29 = vector.load %arg4[%c2_29, %c0_30, %c0_31] : memref<3x128x128xbf16, #tpu.memory_space<vmem>>, vector<1x128x128xbf16>
    %30 = vector.shape_cast %29 : vector<1x128x128xbf16> to vector<128x128xbf16>
    %cst_32 = arith.constant dense<0.000000e+00> : vector<32x128xf32>
    %31 = tpu.matmul %21, %30, %cst_32 {dimension_numbers = #tpu.dot_dimension_numbers<[1], [0], [0], [1], [0, 0, 1, 1], [], []>} : vector<32x128xbf16>, vector<128x128xbf16>, vector<32x128xf32> -> vector<32x128xf32>
    %32 = arith.addf %28, %31 : vector<32x128xf32>
    %c0_33 = arith.constant 0 : index
    %c0_34 = arith.constant 0 : index
    %33 = vector.load %arg5[%c0_33, %c0_34] : memref<1x128xf32, #tpu.memory_space<vmem>>, vector<1x128xf32>
    %34 = vector.broadcast %33 : vector<1x128xf32> to vector<32x128xf32>
    %35 = arith.addf %32, %34 : vector<32x128xf32>
    %cst_35 = arith.constant 0.000000e+00 : f32
    %36 = vector.broadcast %cst_35 : f32 to vector<32x128xf32>
    %37 = arith.maximumf %35, %36 : vector<32x128xf32>
    %38 = vector.shape_cast %37 : vector<32x128xf32> to vector<2x16x128xf32>
    %39 = arith.truncf %38 : vector<2x16x128xf32> to vector<2x16x128xbf16>
    %c0_36 = arith.constant 0 : index
    %c1_37 = arith.constant 1 : index
    %c0_38 = arith.constant 0 : index
    %40 = vector.load %arg11[%c0_36, %c1_37, %c0_38] : memref<2x18x128xbf16, #tpu.memory_space<vmem>>, vector<2x16x128xbf16>
    tpu.vector_store %arg11[%c0_36, %c1_37, %c0_38], %39 {strides = array<i32>} : memref<2x18x128xbf16, #tpu.memory_space<vmem>>, vector<2x16x128xbf16>,
    %c0_39 = arith.constant 0 : index
    %c0_40 = arith.constant 0 : index
    %c0_41 = arith.constant 0 : index
    %41 = vector.load %arg11[%c0_39, %c0_40, %c0_41] : memref<2x18x128xbf16, #tpu.memory_space<vmem>>, vector<2x16x128xbf16>
    %42 = vector.shape_cast %41 : vector<2x16x128xbf16> to vector<32x128xbf16>
    %c0_42 = arith.constant 0 : index
    %c1_43 = arith.constant 1 : index
    %c0_44 = arith.constant 0 : index
    %43 = vector.load %arg11[%c0_42, %c1_43, %c0_44] : memref<2x18x128xbf16, #tpu.memory_space<vmem>>, vector<2x16x128xbf16>
    %44 = vector.shape_cast %43 : vector<2x16x128xbf16> to vector<32x128xbf16>
    %c0_45 = arith.constant 0 : index
    %c2_46 = arith.constant 2 : index
    %c0_47 = arith.constant 0 : index
    %45 = vector.load %arg11[%c0_45, %c2_46, %c0_47] : memref<2x18x128xbf16, #tpu.memory_space<vmem>>, vector<2x16x128xbf16>
    %46 = vector.shape_cast %45 : vector<2x16x128xbf16> to vector<32x128xbf16>
    %c0_48 = arith.constant 0 : index
    %c0_49 = arith.constant 0 : index
    %c0_50 = arith.constant 0 : index
    %47 = vector.load %arg6[%c0_48, %c0_49, %c0_50] : memref<3x128x128xbf16, #tpu.memory_space<vmem>>, vector<1x128x128xbf16>
    %48 = vector.shape_cast %47 : vector<1x128x128xbf16> to vector<128x128xbf16>
    %cst_51 = arith.constant dense<0.000000e+00> : vector<32x128xf32>
    %49 = tpu.matmul %42, %48, %cst_51 {dimension_numbers = #tpu.dot_dimension_numbers<[1], [0], [0], [1], [0, 0, 1, 1], [], []>} : vector<32x128xbf16>, vector<128x128xbf16>, vector<32x128xf32> -> vector<32x128xf32>
    %c1_52 = arith.constant 1 : index
    %c0_53 = arith.constant 0 : index
    %c0_54 = arith.constant 0 : index
    %50 = vector.load %arg6[%c1_52, %c0_53, %c0_54] : memref<3x128x128xbf16, #tpu.memory_space<vmem>>, vector<1x128x128xbf16>
    %51 = vector.shape_cast %50 : vector<1x128x128xbf16> to vector<128x128xbf16>
    %cst_55 = arith.constant dense<0.000000e+00> : vector<32x128xf32>
    %52 = tpu.matmul %44, %51, %cst_55 {dimension_numbers = #tpu.dot_dimension_numbers<[1], [0], [0], [1], [0, 0, 1, 1], [], []>} : vector<32x128xbf16>, vector<128x128xbf16>, vector<32x128xf32> -> vector<32x128xf32>
    %53 = arith.addf %49, %52 : vector<32x128xf32>
    %c2_56 = arith.constant 2 : index
    %c0_57 = arith.constant 0 : index
    %c0_58 = arith.constant 0 : index
    %54 = vector.load %arg6[%c2_56, %c0_57, %c0_58] : memref<3x128x128xbf16, #tpu.memory_space<vmem>>, vector<1x128x128xbf16>
    %55 = vector.shape_cast %54 : vector<1x128x128xbf16> to vector<128x128xbf16>
    %cst_59 = arith.constant dense<0.000000e+00> : vector<32x128xf32>
    %56 = tpu.matmul %46, %55, %cst_59 {dimension_numbers = #tpu.dot_dimension_numbers<[1], [0], [0], [1], [0, 0, 1, 1], [], []>} : vector<32x128xbf16>, vector<128x128xbf16>, vector<32x128xf32> -> vector<32x128xf32>
    %57 = arith.addf %53, %56 : vector<32x128xf32>
    %c0_60 = arith.constant 0 : index
    %c0_61 = arith.constant 0 : index
    %58 = vector.load %arg7[%c0_60, %c0_61] : memref<1x128xf32, #tpu.memory_space<vmem>>, vector<1x128xf32>
    %59 = vector.broadcast %58 : vector<1x128xf32> to vector<32x128xf32>
    %60 = arith.addf %57, %59 : vector<32x128xf32>
    %cst_62 = arith.constant 0.000000e+00 : f32
    %61 = vector.broadcast %cst_62 : f32 to vector<32x128xf32>
    %62 = arith.maximumf %60, %61 : vector<32x128xf32>
    %63 = arith.truncf %62 : vector<32x128xf32> to vector<32x128xbf16>
    %c0_63 = arith.constant 0 : index
    %c0_64 = arith.constant 0 : index
    %64 = vector.load %arg8[%c0_63, %c0_64] : memref<128x128xbf16, #tpu.memory_space<vmem>>, vector<128x128xbf16>
    %cst_65 = arith.constant dense<0.000000e+00> : vector<32x128xf32>
    %65 = tpu.matmul %63, %64, %cst_65 {dimension_numbers = #tpu.dot_dimension_numbers<[1], [0], [0], [1], [0, 0, 1, 1], [], []>} : vector<32x128xbf16>, vector<128x128xbf16>, vector<32x128xf32> -> vector<32x128xf32>
    %c0_66 = arith.constant 0 : index
    %c0_67 = arith.constant 0 : index
    %66 = vector.load %arg9[%c0_66, %c0_67] : memref<1x128xf32, #tpu.memory_space<vmem>>, vector<1x128xf32>
    %67 = vector.broadcast %66 : vector<1x128xf32> to vector<32x128xf32>
    %68 = arith.addf %65, %67 : vector<32x128xf32>
    %c0_68 = arith.constant 0 : index
    %c0_69 = arith.constant 0 : index
    %69 = vector.load %arg10[%c0_68, %c0_69] : memref<32x128xf32, #tpu.memory_space<vmem>>, vector<32x128xf32>
    tpu.vector_store %arg10[%c0_68, %c0_69], %68 {strides = array<i32>} : memref<32x128xf32, #tpu.memory_space<vmem>>, vector<32x128xf32>,
    return
  }
  func.func @transform_0(%arg0: i32) -> (i32, i32) {
    %c0_i32 = arith.constant 0 : i32
    %c0_i32_0 = arith.constant 0 : i32
    return %arg0, %c0_i32 : i32, i32
  }
  func.func @transform_1(%arg0: i32) -> (i32, i32) {
    %c0_i32 = arith.constant 0 : i32
    %c0_i32_0 = arith.constant 0 : i32
    %c0_i32_1 = arith.constant 0 : i32
    return %c0_i32, %c0_i32_0 : i32, i32
  }
  func.func @transform_2(%arg0: i32) -> (i32, i32) {
    %c0_i32 = arith.constant 0 : i32
    %c0_i32_0 = arith.constant 0 : i32
    %c0_i32_1 = arith.constant 0 : i32
    return %c0_i32, %c0_i32_0 : i32, i32
  }
  func.func @transform_3(%arg0: i32) -> (i32, i32, i32) {
    %c0_i32 = arith.constant 0 : i32
    %c0_i32_0 = arith.constant 0 : i32
    %c0_i32_1 = arith.constant 0 : i32
    %c0_i32_2 = arith.constant 0 : i32
    return %c0_i32, %c0_i32_0, %c0_i32_1 : i32, i32, i32
  }
  func.func @transform_4(%arg0: i32) -> (i32, i32) {
    %c0_i32 = arith.constant 0 : i32
    %c0_i32_0 = arith.constant 0 : i32
    %c0_i32_1 = arith.constant 0 : i32
    return %c0_i32, %c0_i32_0 : i32, i32
  }
  func.func @transform_5(%arg0: i32) -> (i32, i32, i32) {
    %c0_i32 = arith.constant 0 : i32
    %c0_i32_0 = arith.constant 0 : i32
    %c0_i32_1 = arith.constant 0 : i32
    %c0_i32_2 = arith.constant 0 : i32
    return %c0_i32, %c0_i32_0, %c0_i32_1 : i32, i32, i32
  }
  func.func @transform_6(%arg0: i32) -> (i32, i32) {
    %c0_i32 = arith.constant 0 : i32
    %c0_i32_0 = arith.constant 0 : i32
    %c0_i32_1 = arith.constant 0 : i32
    return %c0_i32, %c0_i32_0 : i32, i32
  }
  func.func @transform_7(%arg0: i32) -> (i32, i32) {
    %c0_i32 = arith.constant 0 : i32
    %c0_i32_0 = arith.constant 0 : i32
    %c0_i32_1 = arith.constant 0 : i32
    return %c0_i32, %c0_i32_0 : i32, i32
  }
  func.func @transform_8(%arg0: i32) -> (i32, i32) {
    %c0_i32 = arith.constant 0 : i32
    %c0_i32_0 = arith.constant 0 : i32
    %c0_i32_1 = arith.constant 0 : i32
    return %c0_i32, %c0_i32_0 : i32, i32
  }
  func.func @transform_9(%arg0: i32) -> (i32, i32) {
    %c0_i32 = arith.constant 0 : i32
    %c0_i32_0 = arith.constant 0 : i32
    return %arg0, %c0_i32 : i32, i32
  }
}

</mosaic_0001>

<bundles_post_ra>
// kernel: tpu_custom_call.1
= control target key start
LH: loop header
LB: loop body
LE: loop exit
PB: predicated region body
PF: predicated region fallthrough
CT: control target
= control target key end

     0   :  { %14 = vsyncpa [#allocation4], 0  ;;  %s2890_s0 = inlined_call_operand.hbm [shape: bf16[2,16], index: 0, kind: input, shape index: {}]   ;;  %s2891_s1 = inlined_call_operand.hbm [shape: bf16[16,2048], index: 1, kind: input, shape index: {}]   ;;  %s2892_s2 = inlined_call_operand.hbm [shape: f32[1,2048], index: 2, kind: input, shape index: {}]   ;;  %s2893_s3 = inlined_call_operand.hbm [shape: bf16[3,128,128], index: 3, kind: input, shape index: {}]   ;;  %s2894_s4 = inlined_call_operand.vmem [shape: f32[1,128], index: 4, kind: input, shape index: {}]   ;;  %s2895_s5 = inlined_call_operand.hbm [shape: bf16[3,128,128], index: 5, kind: input, shape index: {}]   ;;  %s2896_s6 = inlined_call_operand.vmem [shape: f32[1,128], index: 6, kind: input, shape index: {}]   ;;  %s2897_s7 = inlined_call_operand.hbm [shape: bf16[128,128], index: 7, kind: input, shape index: {}]   ;;  %s2898_s8 = inlined_call_operand.vmem [shape: f32[1,128], index: 8, kind: input, shape index: {}]   ;;  %s2899_s9 = inlined_call_operand.hbm [shape: f32[32,128], index: 9, kind: output, shape index: {}]  }
   0x1   :  { %15 = vsyncpa [#allocation7], 0 }
   0x2   :  { %16 = vsyncpa [#allocation10], 0 }
   0x3   :  { %17 = vsyncpa [#allocation13], 0 }
   0x4   :  { %18 = vsyncpa [#allocation5], 0  ;;  %s2533_s30 = smov [#allocation6]   ;;  %s2369_s13 = scalar_lea.hbm %s2891_s1, 2048 }
   0x5   :  { %s34_s10 = sshll.u32 %s2533_s30, 4  ;;  %p2370_p0 = scmp.ne.s32.totalorder %s2891_s1, %s2369_s13  ;;  %s35_s10 = int_to_ptr.vmem [resolvable:$true] %s34_s10 }
   0x6   :  { %p2373_p1 = scmp.lt.u32.totalorder %s2369_s13, %s2891_s1 }
   0x8   :  { %p2375_p2 = pnand %p2373_p1, %p2370_p0 }
   0xa   :  { %2378 = shalt.err (!%p2375_p2)
}
   0xb   :  { %s2379_s18 = scalar_lea.vmem %s35_s10, 2048  ;;  %p2384_p4 = scmp.lt.s32.totalorder %s35_s10, %s35_s10 }
   0xc   :  { %p2380_p3 = scmp.ne.s32.totalorder %s35_s10, %s2379_s18  ;;  %p2385_p5 = scmp.lt.s32.totalorder %s2379_s18, %s2379_s18 }
   0xe   :  { %p2386_p6 = por %p2385_p5, %p2384_p4 }
  0x10   :  { %p2387_p7 = pnand %p2386_p6, %p2380_p3 }
  0x12   :  { %2390 = shalt.err (!%p2387_p7)
}
  0x13   :  { %s2534_s19 = smov 1024   ;;  %s2535_s20 = smov 64  }
  0x14   :  { %40 = dma.hbm_to_vmem [thread:$0]  %s2891_s1, 2048, %s35_s10, [#allocation7], %s2534_s19, %s2534_s19, %s2535_s20  }
  0x15   :  { %s2536_s23 = smov [#allocation9]   ;;  %s2391_s27 = scalar_lea.hbm %s2893_s3, 3072 }
  0x16   :  { %s56_s24 = sshll.u32 %s2536_s23, 4  ;;  %p2392_p8 = scmp.ne.s32.totalorder %s2893_s3, %s2391_s27  ;;  %s57_s24 = int_to_ptr.vmem [resolvable:$true] %s56_s24 }
  0x17   :  { %p2395_p9 = scmp.lt.u32.totalorder %s2391_s27, %s2893_s3 }
  0x19   :  { %p2397_p10 = pnand %p2395_p9, %p2392_p8 }
  0x1b   :  { %2400 = shalt.err (!%p2397_p10)
}
  0x1c   :  { %s2401_s12 = scalar_lea.vmem %s57_s24, 3072  ;;  %p2406_p12 = scmp.lt.s32.totalorder %s57_s24, %s57_s24 }
  0x1d   :  { %p2402_p11 = scmp.ne.s32.totalorder %s57_s24, %s2401_s12  ;;  %p2407_p13 = scmp.lt.s32.totalorder %s2401_s12, %s2401_s12 }
  0x1f   :  { %p2408_p0 = por %p2407_p13, %p2406_p12 }
  0x21   :  { %p2409_p1 = pnand %p2408_p0, %p2402_p11 }
  0x23   :  { %2412 = shalt.err (!%p2409_p1)
}
  0x24   :  { %s2537_s1 = smov 4   ;;  %s2538_s14 = smov [#allocation3]  }
  0x25   :  { %62 = dma.hbm_to_vmem [thread:$0]  %s2893_s3, 3072, %s57_s24, [#allocation10], %s2535_s20, %s2535_s20, %s2537_s1  }
  0x26   :  { %s25_s15 = sshll.u32 %s2538_s14, 4  ;;  %s2539_s16 = smov [#allocation8]   ;;  %s26_s15 = int_to_ptr.vmem [resolvable:$true] %s25_s15 }
  0x27   :  { %s47_s17 = sshll.u32 %s2539_s16, 4  ;;  %s2413_s21 = scalar_lea.hbm %s2890_s0, 16  ;;  %s48_s17 = int_to_ptr.vmem [resolvable:$true] %s47_s17 }
  0x28   :  { %p2414_p2 = scmp.ne.s32.totalorder %s2890_s0, %s2413_s21  ;;  %p2417_p3 = scmp.lt.u32.totalorder %s2413_s21, %s2890_s0 }
  0x2a   :  { %p2419_p4 = pnand %p2417_p3, %p2414_p2 }
  0x2c   :  { %2422 = shalt.err (!%p2419_p4)
}
  0x2d   :  { %s2423_s3 = scalar_lea.vmem %s26_s15, 16  ;;  %s2427_s24 = scalar_lea.vmem %s26_s15, 32 }
  0x2e   :  { %p2424_p5 = scmp.ne.s32.totalorder %s26_s15, %s2423_s3  ;;  %p2428_p6 = scmp.lt.s32.totalorder %s26_s15, %s26_s15 }
  0x2f   :  { %p2429_p7 = scmp.lt.s32.totalorder %s2427_s24, %s2423_s3 }
  0x31   :  { %p2430_p8 = por %p2429_p7, %p2428_p6 }
  0x33   :  { %p2431_p9 = pnand %p2430_p8, %p2424_p5 }
  0x35   :  { %2434 = shalt.err (!%p2431_p9)
}
  0x36   :  { %28 = dma.hbm_to_vmem [thread:$0]  %s2890_s0, 16, %s26_s15, [#allocation4]  }
  0x37   :  { %s2435_s11 = scalar_lea.hbm %s2892_s2, 256 }
  0x38   :  { %p2436_p10 = scmp.ne.s32.totalorder %s2892_s2, %s2435_s11  ;;  %p2439_p11 = scmp.lt.u32.totalorder %s2435_s11, %s2892_s2 }
  0x3a   :  { %p2441_p12 = pnand %p2439_p11, %p2436_p10 }
  0x3c   :  { %2444 = shalt.err (!%p2441_p12)
}
  0x3d   :  { %s2445_s16 = scalar_lea.vmem %s48_s17, 256  ;;  %p2450_p0 = scmp.lt.s32.totalorder %s48_s17, %s48_s17 }
  0x3e   :  { %p2446_p13 = scmp.ne.s32.totalorder %s48_s17, %s2445_s16  ;;  %p2451_p1 = scmp.lt.s32.totalorder %s2445_s16, %s2445_s16 }
  0x40   :  { %p2452_p2 = por %p2451_p1, %p2450_p0 }
  0x42   :  { %p2453_p3 = pnand %p2452_p2, %p2446_p13 }
  0x44   :  { %2456 = shalt.err (!%p2453_p3)
}
  0x45   :  { %50 = dma.hbm_to_vmem [thread:$0]  %s2892_s2, 256, %s48_s17, [#allocation7]  }
  0x46   :  { %s2540_s18 = smov [#allocation11]   ;;  %s2541_s21 = smov [#allocation12]  }
  0x47   :  { %s70_s19 = sshll.u32 %s2540_s18, 4  ;;  %s84_s22 = sshll.u32 %s2541_s21, 4  ;;  %s71_s19 = int_to_ptr.vmem [resolvable:$true] %s70_s19  ;;  %s85_s22 = int_to_ptr.vmem [resolvable:$true] %s84_s22 }
  0x48   :  { %s2457_s26 = scalar_lea.hbm %s2895_s5, 3072 }
  0x49   :  { %p2458_p4 = scmp.ne.s32.totalorder %s2895_s5, %s2457_s26  ;;  %p2461_p5 = scmp.lt.u32.totalorder %s2457_s26, %s2895_s5 }
  0x4b   :  { %p2463_p6 = pnand %p2461_p5, %p2458_p4 }
  0x4d   :  { %2466 = shalt.err (!%p2463_p6)
}
  0x4e   :  { %s2467_s2 = scalar_lea.vmem %s71_s19, 3072  ;;  %p2472_p8 = scmp.lt.s32.totalorder %s71_s19, %s71_s19 }
  0x4f   :  { %p2468_p7 = scmp.ne.s32.totalorder %s71_s19, %s2467_s2  ;;  %p2473_p9 = scmp.lt.s32.totalorder %s2467_s2, %s2467_s2 }
  0x51   :  { %p2474_p10 = por %p2473_p9, %p2472_p8 }
  0x53   :  { %p2475_p11 = pnand %p2474_p10, %p2468_p7 }
  0x55   :  { %2478 = shalt.err (!%p2475_p11)
}
  0x56   :  { %76 = dma.hbm_to_vmem [thread:$0]  %s2895_s5, 3072, %s71_s19, [#allocation10], %s2535_s20, %s2535_s20, %s2537_s1  }
  0x57   :  { %s2479_s12 = scalar_lea.hbm %s2897_s7, 1024 }
  0x58   :  { %p2480_p12 = scmp.ne.s32.totalorder %s2897_s7, %s2479_s12  ;;  %p2483_p13 = scmp.lt.u32.totalorder %s2479_s12, %s2897_s7 }
  0x5a   :  { %p2485_p0 = pnand %p2483_p13, %p2480_p12 }
  0x5c   :  { %2488 = shalt.err (!%p2485_p0)
}
  0x5d   :  { %s2489_s0 = scalar_lea.vmem %s85_s22, 1024  ;;  %p2494_p2 = scmp.lt.s32.totalorder %s85_s22, %s85_s22 }
  0x5e   :  { %p2490_p1 = scmp.ne.s32.totalorder %s85_s22, %s2489_s0  ;;  %p2495_p3 = scmp.lt.s32.totalorder %s2489_s0, %s2489_s0 }
  0x60   :  { %p2496_p4 = por %p2495_p3, %p2494_p2 }
  0x62   :  { %p2497_p5 = pnand %p2496_p4, %p2490_p1 }
  0x64   :  { %2500 = shalt.err (!%p2497_p5)
}
  0x65   :  { %90 = dma.hbm_to_vmem [thread:$0]  %s2897_s7, 1024, %s85_s22, [#allocation13], %s2535_s20, %s2535_s20, %s2537_s1  }
  0x66   :  { %2523 = dma.done.wait [#allocation4], 16  }
  0x67   :  { %2524 = vsyncadd [#allocation4], 4294967280 }
  0x68   :  { %2525 = dma.done.wait [#allocation7], 2304  }
  0x69   :  { %2526 = vsyncadd [#allocation7], 4294964992 }
  0x6a   :  { %2527 = dma.done.wait [#allocation10], 6144  }
  0x6b   :  { %2528 = vsyncadd [#allocation10], 4294961152 }
  0x6c   :  { %2529 = dma.done.wait [#allocation13], 1024  }
  0x6d   :  { %2530 = vsyncadd [#allocation13], 4294966272  ;;  %v2542_v0 = vmov 0   ;;  %v113_v1 = vld [vmem:[#allocation6] sm:$0xff]  ;;  %v114_v5 = vld [vmem:[#allocation6 + $0x8] sm:$0xff]  ;;  %vm293_vm0 = vcmask 130048   ;;  %v133_v52 = vlaneseq }
  0x6e   :  { %329 = vmatprep.mubr.bf16.mxu1 %v2542_v0  ;;  %493 = vmatprep.mubr.bf16.mxu0 %v2542_v0  ;;  %v121_v2 = vld [vmem:[#allocation6 + $0x40] sm:$0xff]  ;;  %v122_v6 = vld [vmem:[#allocation6 + $0x48] sm:$0xff]  ;;  %v115_v8 = vld [vmem:[#allocation6 + $0x10] sm:$0xff]  ;;  %vm625_vm1 = vcmask 1040384   ;;  %vm626_vm2 = vsmask.f32 256 }
  0x6f   :  { %v1954_v3 = vcombine.high %v113_v1, %v121_v2  ;;  %v1953_v4 = vcombine.low %v113_v1, %v121_v2  ;;  %v1956_v7 = vcombine.high %v114_v5, %v122_v6  ;;  %v123_v9 = vld [vmem:[#allocation6 + $0x50] sm:$0xff]  ;;  %v112_v10 = vld [vmem:[#allocation3] sm:$0x1]  ;;  %v117_v11 = vld [vmem:[#allocation6 + $0x20] sm:$0xff]  ;;  %v1955_v12 = vcombine.low %v114_v5, %v122_v6 }
  0x70   :  { %v125_v13 = vld [vmem:[#allocation6 + $0x60] sm:$0xff]  ;;  %v119_v14 = vld [vmem:[#allocation6 + $0x30] sm:$0xff]  ;;  %v1958_v16 = vcombine.high %v115_v8, %v123_v9  ;;  %v116_v20 = vld [vmem:[#allocation6 + $0x18] sm:$0xff]  ;;  %v1957_v23 = vcombine.low %v115_v8, %v123_v9  ;;  %vm634_vm4 = vsmask.f32 7938  ;;  %v2709_v53 = vshrl.u32 %v133_v52, 7 }
  0x71   :  { %297 = vmatprep.subr.bf16.mxu1 %v1954_v3  ;;  %v127_v15 = vld [vmem:[#allocation6 + $0x70] sm:$0xff]  ;;  %v1962_v17 = vcombine.high %v117_v11, %v125_v13  ;;  %v1961_v18 = vcombine.low %v117_v11, %v125_v13  ;;  %v124_v21 = vld [vmem:[#allocation6 + $0x58] sm:$0xff]  ;;  %v118_v25 = vld [vmem:[#allocation6 + $0x28] sm:$0xff]  ;;  %v2543_v58 = vmov 1983009808   ;;  %vm796_vm6 = vcmask 1043456  }
  0x72   :  { %298 = vmatpush1.bf16.msra.mxu1 %v1953_v4  ;;  %v1966_v19 = vcombine.high %v119_v14, %v127_v15  ;;  %v1965_v22 = vcombine.low %v119_v14, %v127_v15  ;;  %v1960_v24 = vcombine.high %v116_v20, %v124_v21  ;;  %v126_v26 = vld [vmem:[#allocation6 + $0x68] sm:$0xff]  ;;  %v1959_v27 = vcombine.low %v116_v20, %v124_v21  ;;  %v120_v29 = vld [vmem:[#allocation6 + $0x38] sm:$0xff]  ;;  %v628_v34 = vld [vmem:[#allocation2] sm:$0x1] }
  0x73   :  { %338 = vmatprep.subr.bf16.mxu1 %v1956_v7  ;;  %461 = vmatprep.subr.bf16.mxu0 %v1962_v17  ;;  %v1964_v28 = vcombine.high %v118_v25, %v126_v26  ;;  %v128_v30 = vld [vmem:[#allocation6 + $0x78] sm:$0xff]  ;;  %v1963_v31 = vcombine.low %v118_v25, %v126_v26  ;;  %vm2697_vm3 = vmand %vm625_vm1, %vm626_vm2  ;;  %v631_v36 = vld [vmem:[#allocation2 + $0xc] sm:$0x1]  ;;  %v135_v55 = vsub.s32 0, %v2709_v53  ;;  %v143_v57 = vsub.s32 2, %v2709_v53 }
  0x74   :  { %462 = vmatpush1.bf16.msra.mxu0 %v1961_v18  ;;  %v1968_v32 = vcombine.high %v120_v29, %v128_v30  ;;  %v1967_v33 = vcombine.low %v120_v29, %v128_v30  ;;  %v636_v37 = vld [vmem:[#allocation2 + $0x8] sm:$0x1]  ;;  %v629_v38 = vsel %vm2697_vm3, 0, %v628_v34  ;;  %v632_v39 = vsel %vm2697_vm3, 0, %v631_v36  ;;  %vm635_vm5 = vmand %vm625_vm1, %vm634_vm4  ;;  %v639_v40 = vld [vmem:[#allocation2 + $0x14] sm:$0x1] }
  0x75   :  { %1969 = vmatmul.mubr.msk.bf16.vlgmr.msra.gmra.mrb[0].mxu1 %vm293_vm0, %v112_v10  ;;  %543 = vmatprep.subr.bf16.mxu0 %v1966_v19  ;;  %630 = vst [vmem:[#allocation2] sm:$0x1] %v629_v38  ;;  %633 = vst [vmem:[#allocation2 + $0xc] sm:$0x1] %v632_v39  ;;  %v637_v41 = vsel %vm635_vm5, 0, %v636_v37  ;;  %v640_v42 = vsel %vm635_vm5, 0, %v639_v40  ;;  %v644_v59 = vunpack.c.l.s4 %v2543_v58 }
  0x76   :  { %339 = vmatpush1.bf16.msra.mxu1 %v1955_v12  ;;  %370 = vmatprep.mubr.bf16.mxu1 %v2542_v0  ;;  %638 = vst [vmem:[#allocation2 + $0x8] sm:$0x1] %v637_v41  ;;  %641 = vst [vmem:[#allocation2 + $0x14] sm:$0x1] %v640_v42  ;;  %v2309_v43 = vld [vmem:[#allocation9 + $0x40] sm:$0xff]   ;;  %v2310_v44 = vld [vmem:[#allocation9 + $0x48] sm:$0xff]  }
  0x77   :  { %379 = vmatprep.subr.bf16.mxu1 %v1958_v16  ;;  %1973 = vmatmul.mubr.msk.bf16.vlgmr.msra.gmra.mrb[0].mxu0 %vm293_vm0, %v112_v10  ;;  %v2311_v45 = vld [vmem:[#allocation9 + $0x50] sm:$0xff]   ;;  %v2312_v46 = vld [vmem:[#allocation9 + $0x58] sm:$0xff]   ;;  %v2313_v47 = vld [vmem:[#allocation9 + $0x60] sm:$0xff]   ;;  %v139_v61 = vsub.s32 1, %v2709_v53  ;;  %v147_v63 = vsub.s32 3, %v2709_v53  ;;  %v645_v3 = vunpack.c.0.s8 %v644_v59  ;;  %v151_v29 = vsub.s32 4, %v2709_v53 }
  0x78   :  { %544 = vmatpush1.bf16.msra.mxu0 %v1965_v22  ;;  %575 = vmatprep.mubr.bf16.mxu0 %v2542_v0  ;;  %v2314_v48 = vld [vmem:[#allocation9 + $0x68] sm:$0xff]   ;;  %v2315_v49 = vld [vmem:[#allocation9 + $0x70] sm:$0xff]   ;;  %v2316_v50 = vld [vmem:[#allocation9 + $0x78] sm:$0xff]   ;;  %v163_v34 = vsub.s32 7, %v2709_v53  ;;  %v2544_v39 = vmov 1934713408  }
  0x79   :  { %2138 = vmatprep.subr.bf16.mxu0 %v2309_v43  ;;  %v2706_v51 = vld [vmem:[#allocation9] sm:$0xff]   ;;  %v129_v60 = vld [vmem:[#allocation8] sm:$0xff]  ;;  %v2718_v13 = vsub.s32 %v645_v3, %v2709_v53  ;;  %v676_v40 = vunpack.c.l.s4 %v2544_v39  ;;  %vm2737_vm7 = vmand %vm796_vm6, %vm634_vm4  ;;  %vm754_vm8 = vsmask.f32 4368  ;;  %vm818_vm10 = vsmask.f32 3328 }
  0x7a   :  { %v136_v1 = vrot.slane %v129_v60, %v135_v55  ;;  %v144_v2 = vrot.slane %v129_v60, %v143_v57  ;;  %v140_v5 = vrot.slane %v129_v60, %v139_v61  ;;  %v148_v6 = vrot.slane %v129_v60, %v147_v63  ;;  %vm2748_vm9 = vmor %vm626_vm2, %vm754_vm8 }
  0x7b   :  { %v152_v37 = vrot.slane %v129_v60, %v151_v29  ;;  %v164_v42 = vrot.slane %v129_v60, %v163_v34  ;;  %vm819_vm11 = vsmask.f32 7440  ;;  %vm877_vm13 = vcmask 1042432  }
  0x7c   :  { %vm2782_vm12 = vmor %vm818_vm10, %vm819_vm11  ;;  %vm878_vm14 = vcmask 1046532  }
  0x7d   :  { %1970 = vmatmul.mubr.msk.bf16.vlgmr.msra.gmra.mrb[4].mxu1 %vm293_vm0, %v112_v10  ;;  %vm2799_vm15 = vmor %vm877_vm13, %vm878_vm14 }
  0x7e   :  { %380 = vmatpush1.bf16.msra.mxu1 %v1957_v23  ;;  %411 = vmatprep.mubr.bf16.mxu1 %v2542_v0 }
  0x7f   :  { %420 = vmatprep.subr.bf16.mxu1 %v1960_v24  ;;  %1975 = vmatmul.mubr.msk.bf16.vlgmr.msra.gmra.mrb[4].mxu0 %vm293_vm0, %v112_v10 }
  0x80   :  { %2139 = vmatpush3.bf16.msra.mxu0 %v2309_v43 }
  0x81   :  { %2140 = vmatprep.subr.bf16.mxu0 %v2310_v44 }
  0x84   :  { %2141 = vmatpush3.bf16.msra.mxu0 %v2310_v44  ;;  %v130_v44 = vld [vmem:[#allocation8 + $0x8] sm:$0xff] }
  0x85   :  { %1971 = vmatmul.mubr.msk.bf16.vlgmr.msra.gmra.mrb[8].mxu1 %vm293_vm0, %v112_v10  ;;  %2142 = vmatprep.subr.bf16.mxu0 %v2311_v45  ;;  %v168_v58 = vrot.slane %v130_v44, %v135_v55  ;;  %v180_v3 = vrot.slane %v130_v44, %v147_v63 }
  0x86   :  { %421 = vmatpush1.bf16.msra.mxu1 %v1959_v27  ;;  %452 = vmatprep.mubr.bf16.mxu1 %v2542_v0 }
  0x87   :  { %502 = vmatprep.subr.bf16.mxu1 %v1964_v28 }
  0x88   :  { %2143 = vmatpush3.bf16.msra.mxu0 %v2311_v45 }
  0x89   :  { %2144 = vmatprep.subr.bf16.mxu0 %v2312_v46 }
  0x8c   :  { %2145 = vmatpush3.bf16.msra.mxu0 %v2312_v46 }
  0x8d   :  { %1972 = vmatmul.mubr.msk.bf16.vlgmr.msra.gmra.mrb[12].mxu1 %vm293_vm0, %v112_v10  ;;  %2146 = vmatprep.subr.bf16.mxu0 %v2313_v47 }
  0x8e   :  { %503 = vmatpush1.bf16.msra.mxu1 %v1963_v31  ;;  %534 = vmatprep.mubr.bf16.mxu1 %v2542_v0  ;;  %v159_v31 = vsub.s32 6, %v2709_v53 }
  0x8f   :  { %584 = vmatprep.subr.bf16.mxu1 %v1968_v32  ;;  %v155_v32 = vsub.s32 5, %v2709_v53 }
  0x90   :  { %2147 = vmatpush3.bf16.msra.mxu0 %v2313_v47  ;;  %v160_v38 = vrot.slane %v129_v60, %v159_v31  ;;  %v192_v63 = vrot.slane %v130_v44, %v159_v31 }
  0x91   :  { %2148 = vmatprep.subr.bf16.mxu0 %v2314_v48  ;;  %v156_v41 = vrot.slane %v129_v60, %v155_v32 }
  0x94   :  { %2149 = vmatpush3.bf16.msra.mxu0 %v2314_v48  ;;  %v677_v48 = vunpack.c.0.s8 %v676_v40 }
  0x95   :  { %1974 = vmatmul.mubr.msk.bf16.vlgmr.msra.gmra.mrb[16].mxu1 %vm293_vm0, %v112_v10  ;;  %2150 = vmatprep.subr.bf16.mxu0 %v2315_v49 }
  0x96   :  { %585 = vmatpush1.bf16.msra.mxu1 %v1967_v33  ;;  %616 = vmatprep.mubr.bf16.mxu1 %v2542_v0  ;;  %v680_v60 = vsub.s32 %v677_v48, %v2709_v53 }
  0x98   :  { %2151 = vmatpush3.bf16.msra.mxu0 %v2315_v49 }
  0x99   :  { %2152 = vmatprep.subr.bf16.mxu0 %v2316_v50 }
  0x9c   :  { %2153 = vmatpush3.bf16.msra.mxu0 %v2316_v50 }
  0x9d   :  { %1976 = vmatmul.mubr.msk.bf16.vlgmr.msra.gmra.mrb[20].mxu1 %vm293_vm0, %v112_v10  ;;  %2158 = vmatprep.subr.bf16.mxu0 %v2706_v51 }
 0x148   :  { %v331_v54 = vpop.f32.mrb[0].mxu1 }
 0x149   :  { %v333_v56 = vpop.f32.mrb[1].mxu1  ;;  %v332_v11 = vadd.f32 %v331_v54, %v136_v1  ;;  %v176_v1 = vrot.slane %v130_v44, %v143_v57 }
 0x14a   :  { %v335_v62 = vpop.f32.mrb[2].mxu1  ;;  %v495_v4 = vpop.f32.mrb[0].mxu0  ;;  %v334_v15 = vadd.f32 %v333_v56, %v140_v5 }
 0x14b   :  { %v336_v0 = vpop.f32.mrb[3].mxu1  ;;  %v497_v7 = vpop.f32.mrb[1].mxu0  ;;  %v172_v62 = vrot.slane %v130_v44, %v139_v61  ;;  %v496_v5 = vadd.f32 %v495_v4, %v168_v58 }
 0x14c   :  { %v499_v8 = vpop.f32.mrb[2].mxu0 }
 0x14d   :  { %v500_v10 = vpop.f32.mrb[3].mxu0  ;;  %v498_v8 = vadd.f32 %v497_v7, %v172_v62 }
 0x150   :  { %v372_v9 = vpop.f32.mrb[4].mxu1 }
 0x151   :  { %v373_v12 = vadd.f32 %v372_v9, %v144_v2  ;;  %v374_v14 = vpop.f32.mrb[5].mxu1 }
 0x152   :  { %v375_v16 = vadd.f32 %v374_v14, %v148_v6  ;;  %v376_v17 = vpop.f32.mrb[6].mxu1  ;;  %v577_v22 = vpop.f32.mrb[4].mxu0 }
 0x153   :  { %v642_v18 = vcombine.low %v332_v11, %v373_v12  ;;  %v377_v19 = vpop.f32.mrb[7].mxu1  ;;  %v2722_v24 = vpop.f32.mrb[5].mxu0  ;;  %v184_v17 = vrot.slane %v130_v44, %v151_v29 }
 0x154   :  { %v650_v20 = vcombine.low %v334_v15, %v375_v16  ;;  %v581_v25 = vpop.f32.mrb[6].mxu0 }
 0x155   :  { %v649_v21 = vrot.slane %v642_v18, %v2718_v13  ;;  %v582_v28 = vpop.f32.mrb[7].mxu0  ;;  %v578_v25 = vadd.f32 %v577_v22, %v184_v17  ;;  %v798_v22 = vld [vmem:[#allocation2] sm:$0xf] }
 0x156   :  { %v657_v23 = vrot.slane %v650_v20, %v2718_v13  ;;  %v188_v20 = vrot.slane %v130_v44, %v155_v32 }
 0x158   :  { %v674_v26 = vcombine.low %v649_v21, %v657_v23  ;;  %v413_v27 = vpop.f32.mrb[8].mxu1  ;;  %v196_v23 = vrot.slane %v130_v44, %v163_v34  ;;  %v580_v29 = vadd.f32 %v2722_v24, %v188_v20  ;;  %v805_v34 = vld [vmem:[#allocation2 + $0xc] sm:$0xf] }
 0x159   :  { %v415_v30 = vpop.f32.mrb[9].mxu1  ;;  %v414_v45 = vadd.f32 %v413_v27, %v152_v37 }
 0x15a   :  { %v417_v33 = vpop.f32.mrb[10].mxu1  ;;  %v416_v49 = vadd.f32 %v415_v30, %v156_v41  ;;  %v681_v12 = vrot.slane %v674_v26, %v680_v60 }
 0x15b   :  { %v418_v36 = vpop.f32.mrb[11].mxu1 }
 0x160   :  { %v454_v43 = vpop.f32.mrb[12].mxu1 }
 0x161   :  { %v455_v46 = vadd.f32 %v454_v43, %v160_v38  ;;  %v456_v47 = vpop.f32.mrb[13].mxu1 }
 0x162   :  { %v457_v50 = vadd.f32 %v456_v47, %v164_v42  ;;  %v458_v52 = vpop.f32.mrb[14].mxu1 }
 0x163   :  { %v658_v54 = vcombine.low %v414_v45, %v455_v46  ;;  %v459_v56 = vpop.f32.mrb[15].mxu1 }
 0x164   :  { %v666_v59 = vcombine.low %v416_v49, %v457_v50 }
 0x165   :  { %v665_v0 = vrot.slane %v658_v54, %v2718_v13 }
 0x166   :  { %v673_v2 = vrot.slane %v666_v59, %v2718_v13 }
 0x168   :  { %v682_v6 = vcombine.low %v665_v0, %v673_v2  ;;  %v536_v9 = vpop.f32.mrb[16].mxu1 }
 0x169   :  { %v537_v10 = vadd.f32 %v536_v9, %v176_v1  ;;  %v538_v11 = vpop.f32.mrb[17].mxu1 }
 0x16a   :  { %v689_v55 = vrot.slane %v682_v6, %v680_v60  ;;  %v539_v14 = vadd.f32 %v538_v11, %v180_v3  ;;  %v540_v61 = vpop.f32.mrb[18].mxu1 }
 0x16b   :  { %v692_v15 = vcombine.low %v496_v5, %v537_v10  ;;  %v541_v16 = vpop.f32.mrb[19].mxu1 }
 0x16c   :  { %v690_v18 = vcombine.low %v681_v12, %v689_v55  ;;  %v691_v57 = vcombine.high %v681_v12, %v689_v55  ;;  %v700_v19 = vcombine.low %v498_v8, %v539_v14 }
 0x16d   :  { %v699_v53 = vrot.slane %v692_v15, %v2718_v13 }
 0x16e   :  { %v2060_v4 = vpack.c.bf16 %v690_v18, %v690_v18  ;;  %v2062_v21 = vpack.c.bf16 %v691_v57, %v691_v57  ;;  %v707_v7 = vrot.slane %v700_v19, %v2718_v13 }
 0x170   :  { %v757_v26 = vshrl.u32 %v2060_v4, 16  ;;  %v774_v27 = vshrl.u32 %v2062_v21, 16  ;;  %v618_v28 = vpop.f32.mrb[20].mxu1  ;;  %v760_v30 = vshll.u32 %v2060_v4, 16  ;;  %v724_v33 = vcombine.low %v699_v53, %v707_v7 }
 0x171   :  { %v619_v36 = vadd.f32 %v618_v28, %v192_v63  ;;  %v620_v37 = vpop.f32.mrb[21].mxu1  ;;  %v777_v32 = vshll.u32 %v2062_v21, 16 }
 0x172   :  { %v759_v38 = vrot.slane %v757_v26, 7  ;;  %v776_v39 = vrot.slane %v774_v27, 7  ;;  %v621_v31 = vadd.f32 %v620_v37, %v196_v23  ;;  %v622_v40 = vpop.f32.mrb[22].mxu1  ;;  %v731_v52 = vrot.slane %v724_v33, %v680_v60 }
 0x173   :  { %v708_v42 = vcombine.low %v578_v25, %v619_v36  ;;  %v623_v43 = vpop.f32.mrb[23].mxu1 }
 0x174   :  { %v762_v44 = vor.u32 %v760_v30, %v759_v38  ;;  %v779_v45 = vor.u32 %v777_v32, %v776_v39  ;;  %v716_v46 = vcombine.low %v580_v29, %v621_v31  ;;  %v763_v8 = vrot.slane %v759_v38, 4 }
 0x175   :  { %v715_v24 = vrot.slane %v708_v42, %v2718_v13  ;;  %v780_v9 = vrot.slane %v776_v39, 4 }
 0x176   :  { %v799_v47 = vsel %vm2737_vm7, %v762_v44, %v798_v22  ;;  %v806_v48 = vsel %vm2737_vm7, %v779_v45, %v805_v34  ;;  %v723_v49 = vrot.slane %v716_v46, %v2718_v13  ;;  %v802_v13 = vld [vmem:[#allocation2 + $0x8] sm:$0x1] }
 0x177   :  { %800 = vst [vmem:[#allocation2] sm:$0xf] %v799_v47  ;;  %807 = vst [vmem:[#allocation2 + $0xc] sm:$0xf] %v806_v48 }
 0x178   :  { %v732_v50 = vcombine.low %v715_v24, %v723_v49 }
 0x17a   :  { %v739_v54 = vrot.slane %v732_v50, %v680_v60  ;;  %v809_v60 = vld [vmem:[#allocation2 + $0x14] sm:$0x1] }
 0x17c   :  { %v740_v56 = vcombine.low %v731_v52, %v739_v54  ;;  %v741_v58 = vcombine.high %v731_v52, %v739_v54 }
 0x17e   :  { %v2061_v59 = vpack.c.bf16 %v740_v56, %v740_v56  ;;  %v2063_v62 = vpack.c.bf16 %v741_v58, %v741_v58  ;;  %v2752_v61 = vld [vmem:[#allocation2] sm:$0xf]  ;;  %v2762_v57 = vld [vmem:[#allocation2 + $0xc] sm:$0xf] }
 0x17f   :  { %v822_v19 = vshrl.u32 %v2752_v61, 16  ;;  %v825_v53 = vshll.u32 %v2752_v61, 16  ;;  %v846_v20 = vshrl.u32 %v2762_v57, 16  ;;  %v849_v63 = vshll.u32 %v2762_v57, 16 }
 0x180   :  { %v765_v0 = vshrl.u32 %v2061_v59, 16  ;;  %v782_v1 = vshrl.u32 %v2063_v62, 16  ;;  %v768_v3 = vshll.u32 %v2061_v59, 16  ;;  %v785_v6 = vshll.u32 %v2063_v62, 16  ;;  %v2319_v62 = vld [vmem:[#allocation9 + $0x8] sm:$0xff]  }
 0x181   :  { %v824_v4 = vrot.slane %v822_v19, 4  ;;  %v827_v21 = vrot.slane %v825_v53, 5  ;;  %v848_v7 = vrot.slane %v846_v20, 4  ;;  %v851_v23 = vrot.slane %v849_v63, 5  ;;  %v2329_v19 = vld [vmem:[#allocation9 + $0x90] sm:$0xff]   ;;  %v2330_v53 = vld [vmem:[#allocation9 + $0x98] sm:$0xff]  }
 0x182   :  { %v767_v2 = vrot.slane %v765_v0, 7  ;;  %v784_v5 = vrot.slane %v782_v1, 7  ;;  %v2320_v1 = vld [vmem:[#allocation9 + $0x10] sm:$0xff]   ;;  %v2331_v20 = vld [vmem:[#allocation9 + $0xa0] sm:$0xff]  }
 0x183   :  { %v828_v36 = vor.u32 %v827_v21, %v824_v4  ;;  %v852_v40 = vor.u32 %v851_v23, %v848_v7  ;;  %v2333_v63 = vld [vmem:[#allocation9 + $0xb0] sm:$0xff]   ;;  %v2334_v21 = vld [vmem:[#allocation9 + $0xb8] sm:$0xff]   ;;  %v870_v23 = vld [vmem:[#allocation2 + $0xc] sm:$0xe] }
 0x184   :  { %v770_v11 = vor.u32 %v768_v3, %v767_v2  ;;  %v772_v12 = vrot.slane %v767_v2, 4  ;;  %v787_v55 = vor.u32 %v785_v6, %v784_v5  ;;  %v789_v14 = vrot.slane %v784_v5, 4  ;;  %v2321_v2 = vld [vmem:[#allocation9 + $0x18] sm:$0xff]   ;;  %v2322_v3 = vld [vmem:[#allocation9 + $0x20] sm:$0xff]   ;;  %v2323_v5 = vld [vmem:[#allocation9 + $0x28] sm:$0xff]  }
 0x185   :  { %v829_v45 = vrot.slane %v828_v36, 4  ;;  %v853_v47 = vrot.slane %v852_v40, 4  ;;  %v2324_v6 = vld [vmem:[#allocation9 + $0x30] sm:$0xff]   ;;  %v2336_v36 = vld [vmem:[#allocation11 + $0x48] sm:$0xff]   ;;  %v2815_v40 = vld [vmem:[#allocation11] sm:$0xff]  }
 0x186   :  { %v771_v15 = vsel %vm2748_vm9, %v763_v8, %v770_v11  ;;  %v788_v16 = vsel %vm2748_vm9, %v780_v9, %v787_v55  ;;  %v803_v17 = vsel %vm2697_vm3, %v772_v12, %v802_v13  ;;  %v810_v18 = vsel %vm2697_vm3, %v789_v14, %v809_v60  ;;  %v869_v13 = vld [vmem:[#allocation2] sm:$0xe]  ;;  %v2327_v60 = vld [vmem:[#allocation9 + $0x80] sm:$0xff]  }
 0x187   :  { %801 = vst [vmem:[#allocation2 + $0x4] sm:$0xf] %v771_v15  ;;  %804 = vst [vmem:[#allocation2 + $0x8] sm:$0x1] %v803_v17  ;;  %v1981_v55 = vrot.slane %v869_v13, 9  ;;  %v2328_v17 = vld [vmem:[#allocation9 + $0x88] sm:$0xff]  }
 0x188   :  { %808 = vst [vmem:[#allocation2 + $0x10] sm:$0xf] %v788_v16  ;;  %811 = vst [vmem:[#allocation2 + $0x14] sm:$0x1] %v810_v18  ;;  %v2359_v12 = vld [vmem:[#allocation11 + $0xb0] sm:$0xff]  }
 0x18e   :  { %v2768_v25 = vld [vmem:[#allocation2 + $0x4] sm:$0xf]  ;;  %v2770_v26 = vld [vmem:[#allocation2 + $0x8] sm:$0x1] }
 0x18f   :  { %v2772_v27 = vld [vmem:[#allocation2 + $0x10] sm:$0xf]  ;;  %v831_v28 = vshll.u32 %v2768_v25, 16  ;;  %v835_v30 = vshrl.u32 %v2768_v25, 16  ;;  %v2776_v33 = vld [vmem:[#allocation2 + $0x14] sm:$0x1]  ;;  %v1993_v0 = vcombine.low %v2752_v61, %v2768_v25 }
 0x190   :  { %v855_v29 = vshll.u32 %v2772_v27, 16  ;;  %v859_v37 = vshrl.u32 %v2772_v27, 16  ;;  %v841_v32 = vshll.u32 %v2770_v26, 16  ;;  %v865_v34 = vshll.u32 %v2776_v33, 16 }
 0x191   :  { %v833_v38 = vrot.slane %v831_v28, 5  ;;  %v837_v39 = vrot.slane %v835_v30, 4  ;;  %v882_v8 = vrot.slane %v2768_v25, 5  ;;  %v885_v11 = vrot.slane %v2770_v26, 5 }
 0x192   :  { %v857_v31 = vrot.slane %v855_v29, 5  ;;  %v861_v22 = vrot.slane %v859_v37, 4  ;;  %v843_v46 = vrot.slane %v841_v32, 5  ;;  %v867_v49 = vrot.slane %v865_v34, 5  ;;  %v2337_v37 = vld [vmem:[#allocation11 + $0x50] sm:$0xff]   ;;  %v2362_v34 = vld [vmem:[#allocation12 + $0x8] sm:$0xff]  }
 0x193   :  { %v838_v42 = vor.u32 %v837_v39, %v833_v38  ;;  %v834_v50 = vsel %vm2782_vm12, %v829_v45, %v833_v38  ;;  %v884_v9 = vrot.slane %v882_v8, 4  ;;  %v1994_v15 = vcombine.low %v2762_v57, %v2772_v27  ;;  %v2332_v57 = vld [vmem:[#allocation9 + $0xa8] sm:$0xff]   ;;  %v2339_v38 = vld [vmem:[#allocation11 + $0x60] sm:$0xff]   ;;  %v2341_v32 = vld [vmem:[#allocation11 + $0x70] sm:$0xff]  }
 0x194   :  { %v862_v44 = vor.u32 %v861_v22, %v857_v31  ;;  %v858_v56 = vsel %vm2782_vm12, %v853_v47, %v857_v31  ;;  %v883_v16 = vsel %vm2799_vm15, %v1981_v55, %v882_v8  ;;  %v889_v4 = vrot.slane %v2772_v27, 5  ;;  %v2335_v27 = vld [vmem:[#allocation11 + $0x40] sm:$0xff]   ;;  %v2340_v39 = vld [vmem:[#allocation11 + $0x68] sm:$0xff]   ;;  %v2342_v31 = vld [vmem:[#allocation11 + $0x78] sm:$0xff]  }
 0x195   :  { %v839_v24 = vrot.slane %v838_v42, 4  ;;  %v886_v14 = vsel %vm2799_vm15, %v884_v9, %v885_v11  ;;  %v892_v25 = vrot.slane %v2776_v33, 5  ;;  %v1982_v26 = vrot.slane %v870_v23, 9  ;;  %2198 = vmatprep.subr.bf16.mxu1 %v2335_v27  ;;  %v2338_v33 = vld [vmem:[#allocation11 + $0x58] sm:$0xff]   ;;  %v2361_v22 = vld [vmem:[#allocation12] sm:$0xff]   ;;  %v2363_v42 = vld [vmem:[#allocation12 + $0x10] sm:$0xff]  }
 0x196   :  { %v863_v48 = vrot.slane %v862_v44, 4  ;;  %v2003_v18 = vcombine.low %v883_v16, %v886_v14  ;;  %v891_v7 = vrot.slane %v889_v4, 4  ;;  %2199 = vmatpush3.bf16.msra.mxu1 %v2335_v27  ;;  %v2364_v44 = vld [vmem:[#allocation12 + $0x18] sm:$0xff]   ;;  %v2365_v45 = vld [vmem:[#allocation12 + $0x20] sm:$0xff]  }
 0x197   :  { %v844_v52 = vsel %vm2782_vm12, %v839_v24, %v843_v46  ;;  %v890_v30 = vsel %vm2799_vm15, %v1982_v26, %v889_v4  ;;  %2200 = vmatprep.subr.bf16.mxu1 %v2336_v36  ;;  %v2366_v24 = vld [vmem:[#allocation12 + $0x28] sm:$0xff]   ;;  %v2013_v46 = vld [vmem:[%s2894_s4] ss:$0 sm:$0xff]  ;;  %v1335_v27 = vld [vmem:[#allocation2 + $0x8] sm:$0x1] }
 0x198   :  { %v1983_v54 = vcombine.low %v834_v50, %v844_v52  ;;  %v868_v58 = vsel %vm2782_vm12, %v863_v48, %v867_v49  ;;  %v893_v28 = vsel %vm2799_vm15, %v891_v7, %v892_v25  ;;  %v1342_v25 = vld [vmem:[#allocation2 + $0x14] sm:$0x1] }
 0x199   :  { %v1984_v59 = vcombine.low %v858_v56, %v868_v58  ;;  %v2004_v29 = vcombine.low %v890_v30, %v893_v28 }
 0x19a   :  { %2154 = vmatprep.mubr.bf16.mxu0 %v1983_v54  ;;  %2201 = vmatpush3.bf16.msra.mxu1 %v2336_v36 }
 0x19b   :  { %2155 = vmatmul.mubr.bf16.vlgmr.msra.gmra.mrb[8].mxu0 %v1984_v59  ;;  %2202 = vmatprep.subr.bf16.mxu1 %v2337_v37 }
 0x19c   :  { %2159 = vmatpush3.bf16.msra.mxu0 %v2706_v51  ;;  %2174 = vmatprep.mubr.bf16.mxu0 %v1993_v0  ;;  %v2325_v51 = vld [vmem:[#allocation9 + $0x38] sm:$0xff]  }
 0x19d   :  { %2160 = vmatprep.subr.bf16.mxu0 %v2319_v62 }
 0x19e   :  { %2203 = vmatpush3.bf16.msra.mxu1 %v2337_v37 }
 0x19f   :  { %2204 = vmatprep.subr.bf16.mxu1 %v2338_v33 }
 0x1a0   :  { %2161 = vmatpush3.bf16.msra.mxu0 %v2319_v62 }
 0x1a1   :  { %2162 = vmatprep.subr.bf16.mxu0 %v2320_v1 }
 0x1a2   :  { %2205 = vmatpush3.bf16.msra.mxu1 %v2338_v33 }
 0x1a3   :  { %2206 = vmatprep.subr.bf16.mxu1 %v2339_v38 }
 0x1a4   :  { %2163 = vmatpush3.bf16.msra.mxu0 %v2320_v1 }
 0x1a5   :  { %2164 = vmatprep.subr.bf16.mxu0 %v2321_v2 }
 0x1a6   :  { %2207 = vmatpush3.bf16.msra.mxu1 %v2339_v38 }
 0x1a7   :  { %2208 = vmatprep.subr.bf16.mxu1 %v2340_v39 }
 0x1a8   :  { %2165 = vmatpush3.bf16.msra.mxu0 %v2321_v2 }
 0x1a9   :  { %2166 = vmatprep.subr.bf16.mxu0 %v2322_v3 }
 0x1aa   :  { %2209 = vmatpush3.bf16.msra.mxu1 %v2340_v39 }
 0x1ab   :  { %2210 = vmatprep.subr.bf16.mxu1 %v2341_v32 }
 0x1ac   :  { %2167 = vmatpush3.bf16.msra.mxu0 %v2322_v3 }
 0x1ad   :  { %2168 = vmatprep.subr.bf16.mxu0 %v2323_v5 }
 0x1ae   :  { %2211 = vmatpush3.bf16.msra.mxu1 %v2341_v32 }
 0x1af   :  { %2212 = vmatprep.subr.bf16.mxu1 %v2342_v31 }
 0x1b0   :  { %2169 = vmatpush3.bf16.msra.mxu0 %v2323_v5 }
 0x1b1   :  { %2170 = vmatprep.subr.bf16.mxu0 %v2324_v6 }
 0x1b2   :  { %2213 = vmatpush3.bf16.msra.mxu1 %v2342_v31 }
 0x1b3   :  { %2218 = vmatprep.subr.bf16.mxu1 %v2815_v40 }
 0x1b4   :  { %2171 = vmatpush3.bf16.msra.mxu0 %v2324_v6 }
 0x1b5   :  { %2172 = vmatprep.subr.bf16.mxu0 %v2325_v51 }
 0x1b8   :  { %2173 = vmatpush3.bf16.msra.mxu0 %v2325_v51 }
 0x1b9   :  { %2178 = vmatprep.subr.bf16.mxu0 %v2327_v60 }
 0x1bb   :  { %2175 = vmatmul.mubr.bf16.vlgmr.msra.gmra.mrb[8].mxu0 %v1994_v15 }
 0x1bc   :  { %2179 = vmatpush3.bf16.msra.mxu0 %v2327_v60  ;;  %2194 = vmatprep.mubr.bf16.mxu0 %v2003_v18  ;;  %v1338_v18 = vld [vmem:[#allocation2 + $0xc] sm:$0xf] }
 0x1bd   :  { %2180 = vmatprep.subr.bf16.mxu0 %v2328_v17 }
 0x1c0   :  { %2181 = vmatpush3.bf16.msra.mxu0 %v2328_v17 }
 0x1c1   :  { %2182 = vmatprep.subr.bf16.mxu0 %v2329_v19 }
 0x1c4   :  { %2183 = vmatpush3.bf16.msra.mxu0 %v2329_v19 }
 0x1c5   :  { %2184 = vmatprep.subr.bf16.mxu0 %v2330_v53 }
 0x1c8   :  { %2185 = vmatpush3.bf16.msra.mxu0 %v2330_v53 }
 0x1c9   :  { %2186 = vmatprep.subr.bf16.mxu0 %v2331_v20 }
 0x1cc   :  { %2187 = vmatpush3.bf16.msra.mxu0 %v2331_v20 }
 0x1cd   :  { %2188 = vmatprep.subr.bf16.mxu0 %v2332_v57 }
 0x1d0   :  { %2189 = vmatpush3.bf16.msra.mxu0 %v2332_v57 }
 0x1d1   :  { %2190 = vmatprep.subr.bf16.mxu0 %v2333_v63 }
 0x1d4   :  { %2191 = vmatpush3.bf16.msra.mxu0 %v2333_v63 }
 0x1d5   :  { %2192 = vmatprep.subr.bf16.mxu0 %v2334_v21 }
 0x1d8   :  { %2193 = vmatpush3.bf16.msra.mxu0 %v2334_v21 }
 0x1d9   :  { %2258 = vmatprep.subr.bf16.mxu0 %v2361_v22 }
 0x1db   :  { %2195 = vmatmul.mubr.bf16.vlgmr.msra.gmra.mrb[8].mxu0 %v2004_v29 }
 0x1dc   :  { %2259 = vmatpush3.bf16.msra.mxu0 %v2361_v22 }
 0x1dd   :  { %2260 = vmatprep.subr.bf16.mxu0 %v2362_v34 }
 0x1e0   :  { %2261 = vmatpush3.bf16.msra.mxu0 %v2362_v34 }
 0x1e1   :  { %2262 = vmatprep.subr.bf16.mxu0 %v2363_v42 }
 0x1e4   :  { %2263 = vmatpush3.bf16.msra.mxu0 %v2363_v42 }
 0x1e5   :  { %2264 = vmatprep.subr.bf16.mxu0 %v2364_v44 }
 0x1e8   :  { %2265 = vmatpush3.bf16.msra.mxu0 %v2364_v44 }
 0x1e9   :  { %2266 = vmatprep.subr.bf16.mxu0 %v2365_v45 }
 0x1ec   :  { %2267 = vmatpush3.bf16.msra.mxu0 %v2365_v45 }
 0x1ed   :  { %2268 = vmatprep.subr.bf16.mxu0 %v2366_v24 }
 0x1f0   :  { %2269 = vmatpush3.bf16.msra.mxu0 %v2366_v24 }
 0x2ae   :  { %v2196_v47 = vpop.f32.mrb[8].mxu0 }
 0x2af   :  { %v1274_v48 = vadd.f32 %v2196_v47, %v2013_v46  ;;  %v1246_v49 = vpop.f32.mrb[9].mxu0 }
 0x2b0   :  { %v1272_v50 = vadd.f32 %v2013_v46, %v1246_v49  ;;  %v2197_v52 = vpop.f32.mrb[10].mxu0 }
 0x2b1   :  { %v1278_v54 = vmax.f32 %v1274_v48, 0.0  ;;  %v1275_v56 = vadd.f32 %v2197_v52, %v2013_v46  ;;  %v1249_v58 = vpop.f32.mrb[11].mxu0 }
 0x2b2   :  { %v1276_v59 = vmax.f32 %v1272_v50, 0.0  ;;  %v1273_v62 = vadd.f32 %v2013_v46, %v1249_v58 }
 0x2b3   :  { %v2066_v0 = vpack.c.bf16 %v1278_v54, %v1278_v54  ;;  %v1279_v1 = vmax.f32 %v1275_v56, 0.0 }
 0x2b4   :  { %v2064_v2 = vpack.c.bf16 %v1276_v59, %v1276_v59  ;;  %v1277_v3 = vmax.f32 %v1273_v62, 0.0 }
 0x2b5   :  { %v1310_v5 = vshrl.u32 %v2066_v0, 16  ;;  %v2067_v6 = vpack.c.bf16 %v1279_v1, %v1279_v1  ;;  %v1313_v13 = vshll.u32 %v2066_v0, 16 }
 0x2b6   :  { %v1293_v8 = vshrl.u32 %v2064_v2, 16  ;;  %v2065_v51 = vpack.c.bf16 %v1277_v3, %v1277_v3  ;;  %v1296_v55 = vshll.u32 %v2064_v2, 16 }
 0x2b7   :  { %v1312_v9 = vrot.slane %v1310_v5, 7  ;;  %v1318_v60 = vshrl.u32 %v2067_v6, 16  ;;  %v1321_v17 = vshll.u32 %v2067_v6, 16 }
 0x2b8   :  { %v1295_v11 = vrot.slane %v1293_v8, 7  ;;  %v1301_v14 = vshrl.u32 %v2065_v51, 16  ;;  %v1304_v20 = vshll.u32 %v2065_v51, 16 }
 0x2b9   :  { %v1315_v15 = vor.u32 %v1313_v13, %v1312_v9  ;;  %v1320_v16 = vrot.slane %v1318_v60, 7  ;;  %v1316_v57 = vrot.slane %v1312_v9, 4 }
 0x2ba   :  { %v1298_v19 = vor.u32 %v1296_v55, %v1295_v11  ;;  %v1303_v53 = vrot.slane %v1301_v14, 7  ;;  %v1299_v7 = vrot.slane %v1295_v11, 4 }
 0x2bb   :  { %v1339_v63 = vsel %vm2737_vm7, %v1315_v15, %v1338_v18  ;;  %v1323_v4 = vor.u32 %v1321_v17, %v1320_v16  ;;  %v1325_v21 = vrot.slane %v1320_v16, 4  ;;  %v2345_v17 = vld [vmem:[#allocation11 + $0x8] sm:$0xff]  }
 0x2bc   :  { %1340 = vst [vmem:[#allocation2 + $0xc] sm:$0xf] %v1339_v63  ;;  %v1332_v23 = vsel %vm2737_vm7, %v1298_v19, %v2752_v61  ;;  %v1306_v26 = vor.u32 %v1304_v20, %v1303_v53  ;;  %v1308_v28 = vrot.slane %v1303_v53, 4 }
 0x2bd   :  { %1333 = vst [vmem:[#allocation2] sm:$0xf] %v1332_v23  ;;  %v1324_v30 = vsel %vm2748_vm9, %v1316_v57, %v1323_v4  ;;  %v1343_v29 = vsel %vm2697_vm3, %v1325_v21, %v1342_v25  ;;  %v2346_v4 = vld [vmem:[#allocation11 + $0x10] sm:$0xff]   ;;  %v2347_v21 = vld [vmem:[#allocation11 + $0x18] sm:$0xff]   ;;  %v2349_v23 = vld [vmem:[#allocation11 + $0x28] sm:$0xff]  }
 0x2be   :  { %1341 = vst [vmem:[#allocation2 + $0x10] sm:$0xf] %v1324_v30  ;;  %1344 = vst [vmem:[#allocation2 + $0x14] sm:$0x1] %v1343_v29  ;;  %v1307_v36 = vsel %vm2748_vm9, %v1299_v7, %v1306_v26  ;;  %v1336_v41 = vsel %vm2697_vm3, %v1308_v28, %v1335_v27  ;;  %v2348_v7 = vld [vmem:[#allocation11 + $0x20] sm:$0xff]   ;;  %v2350_v25 = vld [vmem:[#allocation11 + $0x30] sm:$0xff]  }
 0x2bf   :  { %1334 = vst [vmem:[#allocation2 + $0x4] sm:$0xf] %v1307_v36  ;;  %1337 = vst [vmem:[#allocation2 + $0x8] sm:$0x1] %v1336_v41  ;;  %v2353_v29 = vld [vmem:[#allocation11 + $0x80] sm:$0xff]  }
 0x2c3   :  { %v2834_v61 = vld [vmem:[#allocation2 + $0xc] sm:$0xf] }
 0x2c4   :  { %v1345_v37 = vld [vmem:[#allocation2] sm:$0xf]  ;;  %v1376_v33 = vshrl.u32 %v2834_v61, 16  ;;  %v1379_v38 = vshll.u32 %v2834_v61, 16  ;;  %v1400_v9 = vld [vmem:[#allocation2 + $0xc] sm:$0xe] }
 0x2c5   :  { %v1352_v39 = vshrl.u32 %v1345_v37, 16  ;;  %v1355_v32 = vshll.u32 %v1345_v37, 16  ;;  %v2838_v31 = vld [vmem:[#allocation2 + $0x10] sm:$0xf]  ;;  %v1350_v46 = vld [vmem:[#allocation2 + $0x14] sm:$0x1] }
 0x2c6   :  { %v2840_v22 = vld [vmem:[#allocation2 + $0x4] sm:$0xf]  ;;  %v2842_v10 = vld [vmem:[#allocation2 + $0x8] sm:$0x1]  ;;  %v1378_v34 = vrot.slane %v1376_v33, 4  ;;  %v1381_v35 = vrot.slane %v1379_v38, 5 }
 0x2c7   :  { %v1354_v42 = vrot.slane %v1352_v39, 4  ;;  %v1357_v44 = vrot.slane %v1355_v32, 5  ;;  %v1361_v45 = vshll.u32 %v2840_v22, 16  ;;  %v1365_v24 = vshrl.u32 %v2840_v22, 16  ;;  %v1399_v30 = vld [vmem:[#allocation2] sm:$0xe] }
 0x2c8   :  { %v1382_v47 = vor.u32 %v1381_v35, %v1378_v34  ;;  %v1385_v48 = vshll.u32 %v2838_v31, 16  ;;  %v1389_v49 = vshrl.u32 %v2838_v31, 16  ;;  %v1371_v56 = vshll.u32 %v2842_v10, 16  ;;  %v2354_v38 = vld [vmem:[#allocation11 + $0x88] sm:$0xff]   ;;  %v2355_v32 = vld [vmem:[#allocation11 + $0x90] sm:$0xff]   ;;  %v2368_v35 = vld [vmem:[#allocation12 + $0x38] sm:$0xff]  }
 0x2c9   :  { %v1358_v50 = vor.u32 %v1357_v44, %v1354_v42  ;;  %v1363_v52 = vrot.slane %v1361_v45, 5  ;;  %v1367_v54 = vrot.slane %v1365_v24, 4  ;;  %v1395_v62 = vshll.u32 %v1350_v46, 16  ;;  %v2367_v34 = vld [vmem:[#allocation12 + $0x30] sm:$0xff]  }
 0x2ca   :  { %v1387_v58 = vrot.slane %v1385_v48, 5  ;;  %v1391_v59 = vrot.slane %v1389_v49, 4  ;;  %v1383_v2 = vrot.slane %v1382_v47, 4  ;;  %v1373_v6 = vrot.slane %v1371_v56, 5  ;;  %2270 = vmatprep.subr.bf16.mxu0 %v2367_v34  ;;  %v2050_v42 = vld [vmem:[%s2896_s6] ss:$0 sm:$0xff] }
 0x2cb   :  { %v1359_v0 = vrot.slane %v1358_v50, 4  ;;  %v1368_v1 = vor.u32 %v1367_v54, %v1363_v52  ;;  %v1397_v51 = vrot.slane %v1395_v62, 5  ;;  %v1416_v13 = vrot.slane %v2838_v31, 5  ;;  %2271 = vmatpush3.bf16.msra.mxu0 %v2367_v34  ;;  %s2545_s6 = smov [#allocation14]  }
 0x2cc   :  { %v1392_v3 = vor.u32 %v1391_v59, %v1387_v58  ;;  %v1388_v14 = vsel %vm2782_vm12, %v1383_v2, %v1387_v58  ;;  %v2019_v18 = vrot.slane %v1400_v9, 9  ;;  %v1419_v53 = vrot.slane %v1350_v46, 5  ;;  %2272 = vmatprep.subr.bf16.mxu0 %v2368_v35  ;;  %s1938_s21 = sshll.u32 %s2545_s6, 4  ;;  %s1939_s21 = int_to_ptr.vmem [resolvable:$true] %s1938_s21 }
 0x2cd   :  { %v1369_v5 = vrot.slane %v1368_v1, 4  ;;  %v1364_v60 = vsel %vm2782_vm12, %v1359_v0, %v1363_v52  ;;  %v1418_v19 = vrot.slane %v1416_v13, 4  ;;  %v2030_v20 = vcombine.low %v1345_v37, %v2840_v22  ;;  %v2051_v0 = vld [vmem:[%s2898_s8] ss:$0 sm:$0xff]  ;;  %s2501_s22 = scalar_lea.vmem %s1939_s21, 512  ;;  %p2506_p7 = scmp.lt.s32.totalorder %s1939_s21, %s1939_s21 }
 0x2ce   :  { %v1393_v8 = vrot.slane %v1392_v3, 4  ;;  %v1417_v57 = vsel %vm2799_vm15, %v2019_v18, %v1416_v13  ;;  %v1409_v26 = vrot.slane %v2840_v22, 5  ;;  %v1412_v27 = vrot.slane %v2842_v10, 5  ;;  %v2356_v22 = vld [vmem:[#allocation11 + $0x98] sm:$0xff]   ;;  %v2357_v10 = vld [vmem:[#allocation11 + $0xa0] sm:$0xff]   ;;  %p2502_p6 = scmp.ne.s32.totalorder %s1939_s21, %s2501_s22  ;;  %p2507_p8 = scmp.lt.s32.totalorder %s2501_s22, %s2501_s22 }
 0x2cf   :  { %v1374_v11 = vsel %vm2782_vm12, %v1369_v5, %v1373_v6  ;;  %v1420_v63 = vsel %vm2799_vm15, %v1418_v19, %v1419_v53  ;;  %v2018_v36 = vrot.slane %v1399_v30, 9  ;;  %v2031_v37 = vcombine.low %v2834_v61, %v2838_v31  ;;  %v2358_v61 = vld [vmem:[#allocation11 + $0xa8] sm:$0xff]   ;;  %v2360_v31 = vld [vmem:[#allocation11 + $0xb8] sm:$0xff]   ;;  %2273 = vmatpush3.bf16.msra.mxu0 %v2368_v35 }
 0x2d0   :  { %v2020_v55 = vcombine.low %v1364_v60, %v1374_v11  ;;  %v1398_v15 = vsel %vm2782_vm12, %v1393_v8, %v1397_v51  ;;  %v2041_v43 = vcombine.low %v1417_v57, %v1420_v63  ;;  %v1411_v28 = vrot.slane %v1409_v26, 4  ;;  %p2508_p9 = por %p2507_p8, %p2506_p7 }
 0x2d1   :  { %v2021_v16 = vcombine.low %v1388_v14, %v1398_v15  ;;  %v1410_v33 = vsel %vm2799_vm15, %v2018_v36, %v1409_v26 }
 0x2d2   :  { %2214 = vmatprep.mubr.bf16.mxu1 %v2020_v55  ;;  %v1413_v41 = vsel %vm2799_vm15, %v1411_v28, %v1412_v27  ;;  %p2509_p10 = pnand %p2508_p9, %p2502_p6 }
 0x2d3   :  { %2215 = vmatmul.mubr.bf16.vlgmr.msra.gmra.mrb[24].mxu1 %v2021_v16  ;;  %v2040_v39 = vcombine.low %v1410_v33, %v1413_v41 }
 0x2d4   :  { %2219 = vmatpush3.bf16.msra.mxu1 %v2815_v40  ;;  %2234 = vmatprep.mubr.bf16.mxu1 %v2030_v20  ;;  %v2351_v40 = vld [vmem:[#allocation11 + $0x38] sm:$0xff]  }
 0x2d5   :  { %2220 = vmatprep.subr.bf16.mxu1 %v2345_v17 }
 0x2d8   :  { %2221 = vmatpush3.bf16.msra.mxu1 %v2345_v17 }
 0x2d9   :  { %2222 = vmatprep.subr.bf16.mxu1 %v2346_v4 }
 0x2dc   :  { %2223 = vmatpush3.bf16.msra.mxu1 %v2346_v4 }
 0x2dd   :  { %2224 = vmatprep.subr.bf16.mxu1 %v2347_v21 }
 0x2e0   :  { %2225 = vmatpush3.bf16.msra.mxu1 %v2347_v21 }
 0x2e1   :  { %2226 = vmatprep.subr.bf16.mxu1 %v2348_v7 }
 0x2e4   :  { %2227 = vmatpush3.bf16.msra.mxu1 %v2348_v7 }
 0x2e5   :  { %2228 = vmatprep.subr.bf16.mxu1 %v2349_v23 }
 0x2e8   :  { %2229 = vmatpush3.bf16.msra.mxu1 %v2349_v23 }
 0x2e9   :  { %2230 = vmatprep.subr.bf16.mxu1 %v2350_v25 }
 0x2ec   :  { %2231 = vmatpush3.bf16.msra.mxu1 %v2350_v25 }
 0x2ed   :  { %2232 = vmatprep.subr.bf16.mxu1 %v2351_v40 }
 0x2f0   :  { %2233 = vmatpush3.bf16.msra.mxu1 %v2351_v40 }
 0x2f1   :  { %2238 = vmatprep.subr.bf16.mxu1 %v2353_v29 }
 0x2f3   :  { %2235 = vmatmul.mubr.bf16.vlgmr.msra.gmra.mrb[24].mxu1 %v2031_v37 }
 0x2f4   :  { %2239 = vmatpush3.bf16.msra.mxu1 %v2353_v29  ;;  %2254 = vmatprep.mubr.bf16.mxu1 %v2040_v39 }
 0x2f5   :  { %2240 = vmatprep.subr.bf16.mxu1 %v2354_v38 }
 0x2f8   :  { %2241 = vmatpush3.bf16.msra.mxu1 %v2354_v38 }
 0x2f9   :  { %2242 = vmatprep.subr.bf16.mxu1 %v2355_v32 }
 0x2fc   :  { %2243 = vmatpush3.bf16.msra.mxu1 %v2355_v32 }
 0x2fd   :  { %2244 = vmatprep.subr.bf16.mxu1 %v2356_v22 }
 0x300   :  { %2245 = vmatpush3.bf16.msra.mxu1 %v2356_v22 }
 0x301   :  { %2246 = vmatprep.subr.bf16.mxu1 %v2357_v10 }
 0x304   :  { %2247 = vmatpush3.bf16.msra.mxu1 %v2357_v10 }
 0x305   :  { %2248 = vmatprep.subr.bf16.mxu1 %v2358_v61 }
 0x308   :  { %2249 = vmatpush3.bf16.msra.mxu1 %v2358_v61 }
 0x309   :  { %2250 = vmatprep.subr.bf16.mxu1 %v2359_v12 }
 0x30c   :  { %2251 = vmatpush3.bf16.msra.mxu1 %v2359_v12 }
 0x30d   :  { %2252 = vmatprep.subr.bf16.mxu1 %v2360_v31 }
 0x310   :  { %2253 = vmatpush3.bf16.msra.mxu1 %v2360_v31 }
 0x313   :  { %2255 = vmatmul.mubr.bf16.vlgmr.msra.gmra.mrb[24].mxu1 %v2041_v43 }
 0x3e6   :  { %v2256_v44 = vpop.f32.mrb[24].mxu1 }
 0x3e7   :  { %v1801_v45 = vadd.f32 %v2256_v44, %v2050_v42  ;;  %v1773_v24 = vpop.f32.mrb[25].mxu1 }
 0x3e8   :  { %v1799_v46 = vadd.f32 %v2050_v42, %v1773_v24  ;;  %v2257_v47 = vpop.f32.mrb[26].mxu1 }
 0x3e9   :  { %v1802_v48 = vadd.f32 %v2257_v47, %v2050_v42  ;;  %v1776_v49 = vpop.f32.mrb[27].mxu1  ;;  %v1805_v52 = vmax.f32 %v1801_v45, 0.0 }
 0x3ea   :  { %v1800_v50 = vadd.f32 %v2050_v42, %v1776_v49  ;;  %v1803_v56 = vmax.f32 %v1799_v46, 0.0 }
 0x3eb   :  { %v1806_v54 = vmax.f32 %v1802_v48, 0.0 }
 0x3ec   :  { %v1804_v58 = vmax.f32 %v1800_v50, 0.0 }
 0x3ed   :  { %v1808_v59 = vpack.c.bf16 %v1806_v54, %v1805_v52 }
 0x3ee   :  { %v1807_v62 = vpack.c.bf16 %v1804_v58, %v1803_v56 }
 0x3f0   :  { %2274 = vmatprep.mubr.bf16.mxu0 %v1807_v62 }
 0x3f1   :  { %2275 = vmatmul.mubr.bf16.vlgmr.msra.gmra.mrb[12].mxu0 %v1808_v59 }
 0x4c4   :  { %v2276_v1 = vpop.f32.mrb[12].mxu0 }
 0x4c5   :  { %v1923_v2 = vadd.f32 %v2276_v1, %v2051_v0  ;;  %v1914_v3 = vpop.f32.mrb[13].mxu0 }
 0x4c6   :  { %v1915_v5 = vadd.f32 %v2051_v0, %v1914_v3  ;;  %v2277_v6 = vpop.f32.mrb[14].mxu0 }
 0x4c7   :  { %1931 = vst [vmem:[#allocation14 + $0x10] sm:$0xff] %v1923_v2  ;;  %v1926_v8 = vadd.f32 %v2277_v6, %v2051_v0  ;;  %v1917_v51 = vpop.f32.mrb[15].mxu0 }
 0x4c8   :  { %1929 = vst [vmem:[#allocation14] sm:$0xff] %v1915_v5  ;;  %v1918_v9 = vadd.f32 %v2051_v0, %v1917_v51 }
 0x4c9   :  { %1932 = vst [vmem:[#allocation14 + $0x18] sm:$0xff] %v1926_v8 }
 0x4ca   :  { %1930 = vst [vmem:[#allocation14 + $0x8] sm:$0xff] %v1918_v9 }
 0x4cb   :  { %2512 = shalt.err (!%p2509_p10)
}
 0x4cc   :  { %s2513_s25 = scalar_lea.hbm %s2899_s9, 512 }
 0x4cd   :  { %p2514_p11 = scmp.ne.s32.totalorder %s2899_s9, %s2513_s25  ;;  %p2517_p12 = scmp.lt.u32.totalorder %s2513_s25, %s2899_s9 }
 0x4cf   :  { %p2519_p13 = pnand %p2517_p12, %p2514_p11 }
 0x4d1   :  { %2522 = shalt.err (!%p2519_p13)
}
 0x4d2   :  { %s2546_s28 = smov 128   ;;  %s2547_s2 = smov 8  }
 0x4d3   :  { %1944 = dma.vmem_to_hbm [thread:$0]  %s1939_s21, 512, %s2899_s9, [#allocation5], %s2546_s28, %s2546_s28, %s2547_s2  }
 0x4d4   :  { %2531 = dma.done.wait [#allocation5], 512  }
 0x4d5   :  { %2532 = vsyncadd [#allocation5], 4294966784 }
 0x4d6   :  { %1948 = vsyncpa [#allocation4], 1 }
 0x4d7   :  { %1949 = vsyncpa [#allocation7], 1 }
 0x4d8   :  { %1950 = vsyncpa [#allocation10], 1 }
 0x4d9   :  { %1951 = vsyncpa [#allocation13], 1 }
 0x4da   :  { %1952 = vsyncpa [#allocation5], 1 }

</bundles_post_ra>
